<compile_context>
chip_gen: v5e
topology: v5e:2x2
jax: 0.10.0
libtpu: 0.0.40
codegen_flags: <defaults>
</compile_context>

<pallas_src>
import functools

import jax
import jax.numpy as jnp
from jax.experimental import pallas as pl
from jax.experimental.pallas import tpu as pltpu


def _round_up(x, m):
    return ((x + m - 1) // m) * m


def _ccn_mse_kernel(x_ref, dot_ref, mask_ref, w1_ref, b1_ref, w2_ref, b2_ref,
                    w3_ref, b3_ref, dens_ref, lpart_ref, *,
                    cin, c1, row_stride, l_out):
    """One (image, row-block) tile of the fused CCN forward + MSE partials.

    Pixels (row-major with stride `row_stride` = W+2, incl. the zero-pad
    columns) live in the LANE dim; channels live in sublanes.

    x_ref    : (1, Cin, L_in)  raw padded input rows for this tile (w/ halo)
    dot_ref  : (1, 1, L_out)   ground-truth dot map, junk positions pre-zeroed
    mask_ref : (1, 1, L_out)   1.0 at valid output pixels, 0.0 elsewhere
    w1_ref   : (C1, 9*Cin)     3x3 conv; tap k occupies columns k*Cin:(k+1)*Cin
    b1_ref   : (C1, 1)
    w2_ref   : (C2, C1)        1x1 conv
    b2_ref   : (C2, 1)
    w3_ref   : (C2, 1)         density head (1x1 conv to 1 channel)
    b3_ref   : (1, 1)
    dens_ref : (1, 1, L_out)   density output tile (lane-dense)
    lpart_ref: (1, 1, 128)     per-lane partial sums of squared error
    """
    x = x_ref[0]                                              # (Cin, L_in)

    # conv1: 3x3 "same" conv as 9 shifted matmul-accumulates over the raw
    # Cin-channel pixel stream (no HBM im2col).  Tap (dy, dx) of output
    # pixel p reads input pixel p + dy*row_stride + dx in the flat layout.
    acc1 = jnp.zeros((c1, l_out), jnp.float32)
    for k in range(9):
        dy, dx = k // 3, k % 3
        shift = dy * row_stride + dx
        x_tap = x[:, shift:shift + l_out]                     # lane shift only
        w_tap = w1_ref[:, k * cin:(k + 1) * cin]              # (C1, Cin)
        acc1 = acc1 + jnp.dot(w_tap, x_tap,
                              preferred_element_type=jnp.float32)
    h1 = jnp.maximum(acc1 + b1_ref[...], 0.0)                 # (C1, L_out)

    # conv2: 1x1 conv + bias + ReLU.
    h2 = jnp.maximum(
        jnp.dot(w2_ref[...], h1, preferred_element_type=jnp.float32)
        + b2_ref[...], 0.0)                                   # (C2, L_out)

    # conv3 (1 output channel): VPU multiply + sublane reduce instead of an
    # MXU matmul with output width 1.
    dens = (jnp.sum(w3_ref[...] * h2, axis=0, keepdims=True)
            + b3_ref[...])                                    # (1, L_out)
    dens_ref[...] = dens[None, :, :]                          # lane-dense store

    # MSE partials, kept per-lane: aligned 128-wide chunks accumulated with
    # VPU adds only (no cross-lane reduce, no broadcast in the epilogue).
    diff = (dens - dot_ref[0]) * mask_ref[0]                  # (1, L_out)
    sq = diff * diff
    part = sq[:, 0:128]
    for k in range(1, l_out // 128):
        part = part + sq[:, k * 128:(k + 1) * 128]
    lpart_ref[...] = part[None, :, :]


def crowd_counter_forward(img_nchw, dot_map, params, *, target_lanes=2048):
    """Mirrors CrowdCounter.forward: returns (density_map, dot_map, loss_mse)."""
    w1, b1, w2, b2, w3, b3 = params
    N, Cin, H, W = img_nchw.shape
    C1 = w1.shape[-1]
    C2 = w2.shape[-1]
    M = N * H * W
    Wp = W + 2                                  # padded row stride

    # Rows per grid tile: target ~2048 output lanes/tile to amortize per-step
    # overhead, but keep >= 2 tiles total so both v7x TensorCores get work.
    TR = max(1, min(H, target_lanes // Wp))
    num_rb = -(-H // TR)
    if N * num_rb < 2 and H > 1:
        TR = -(-H // 2)
        num_rb = -(-H // TR)
    H_pad = num_rb * TR
    T = N * num_rb

    L_out = _round_up(TR * Wp, 128)             # output lanes per tile
    L_in = _round_up(L_out + 2 * Wp + 2, 128)   # covers max tap shift

    # ---- wrapper-side staging (NO 9x im2col; only a 1-row halo per block).
    x_cnhw = jnp.transpose(img_nchw, (1, 0, 2, 3)).astype(jnp.float32)
    xpad = jnp.pad(x_cnhw, ((0, 0), (0, 0), (1, 1 + H_pad - H), (1, 1)))
    blocks = jnp.stack([xpad[:, :, b * TR:b * TR + TR + 2, :]
                        for b in range(num_rb)], axis=0)   # (nb,Cin,N,TR+2,Wp)
    blocks = jnp.transpose(blocks, (2, 0, 1, 3, 4))        # (N,nb,Cin,TR+2,Wp)
    x_tiles = blocks.reshape(T, Cin, (TR + 2) * Wp)
    x_tiles = jnp.pad(x_tiles, ((0, 0), (0, 0), (0, L_in - (TR + 2) * Wp)))

    dot_f = dot_map.astype(jnp.float32).reshape(N, H, W)
    dotp = jnp.pad(dot_f, ((0, 0), (0, H_pad - H), (0, 2)))     # (N,H_pad,Wp)
    dot_tiles = jnp.pad(dotp.reshape(T, TR * Wp),
                        ((0, 0), (0, L_out - TR * Wp)))[:, None, :]

    maskp = jnp.pad(jnp.ones((N, H, W), jnp.float32),
                    ((0, 0), (0, H_pad - H), (0, 2)))
    mask_tiles = jnp.pad(maskp.reshape(T, TR * Wp),
                         ((0, 0), (0, L_out - TR * Wp)))[:, None, :]

    # Weights in (C_out, C_in) layout; tap k columns of w1_t are w1[dy,dx].T.
    K1 = 9 * Cin
    w1_t = jnp.transpose(w1.reshape(9, Cin, C1), (2, 0, 1)).reshape(C1, K1)
    b1_t = b1.reshape(C1, 1)
    w2_t = w2.T
    b2_t = b2.reshape(C2, 1)
    w3_t = w3.reshape(C2, 1)
    b3_t = b3.reshape(1, 1)

    kernel = functools.partial(_ccn_mse_kernel, cin=Cin, c1=C1,
                               row_stride=Wp, l_out=L_out)

    def tile_spec(c, l):
        return pl.BlockSpec((1, c, l), lambda t: (t, 0, 0))

    def full(shape):
        return pl.BlockSpec(shape, lambda t: (0, 0))

    flops = 2 * T * L_out * (9 * Cin * C1 + C1 * C2 + C2)
    bytes_accessed = 4 * (T * (Cin * L_in + 3 * L_out + 128)
                          + C1 * K1 + C1 + C2 * C1 + 2 * C2 + 1)

    dens_tiles, lparts = pl.pallas_call(
        kernel,
        grid=(T,),
        in_specs=[
            tile_spec(Cin, L_in),          # raw input rows (with halo)
            tile_spec(1, L_out),           # dot-map tile
            tile_spec(1, L_out),           # validity mask
            full((C1, K1)), full((C1, 1)),
            full((C2, C1)), full((C2, 1)),
            full((C2, 1)), full((1, 1)),
        ],
        out_specs=(
            tile_spec(1, L_out),           # density tile
            tile_spec(1, 128),             # per-lane MSE partial sums
        ),
        out_shape=(
            jax.ShapeDtypeStruct((T, 1, L_out), jnp.float32),
            jax.ShapeDtypeStruct((T, 1, 128), jnp.float32),
        ),
        compiler_params=pltpu.CompilerParams(
            dimension_semantics=("parallel",),
            vmem_limit_bytes=32 * 1024 * 1024),
        cost_estimate=pl.CostEstimate(flops=flops, transcendentals=0,
                                      bytes_accessed=bytes_accessed),
    )(x_tiles, dot_tiles, mask_tiles, w1_t, b1_t, w2_t, b2_t, w3_t, b3_t)

    # Back to PyTorch-style NCHW density map: (N, 1, H, W).
    dens = dens_tiles[:, 0, :TR * Wp].reshape(N, num_rb, TR, Wp)
    dens = dens[..., :W].reshape(N, H_pad, W)[:, :H, :]
    density_map = dens[:, None, :, :]
    loss = jnp.sum(lparts) / jnp.float32(M)
    return density_map, dot_map, loss


def _reference(img_nchw, dot_map, params):
    """Pure-JAX reference of the same synthetic CCN + MSE."""
    w1, b1, w2, b2, w3, b3 = params
    N, Cin, H, W = img_nchw.shape
    x = jnp.transpose(img_nchw, (0, 2, 3, 1)).astype(jnp.float32)
    xpad = jnp.pad(x, ((0, 0), (1, 1), (1, 1), (0, 0)))
    acc = jnp.zeros((N, H, W, w1.shape[-1]), jnp.float32)
    for dy in range(3):
        for dx in range(3):
            acc = acc + jnp.einsum('nhwc,cd->nhwd',
                                   xpad[:, dy:dy + H, dx:dx + W, :], w1[dy, dx])
    h1 = jax.nn.relu(acc + b1[0])
    h2 = jax.nn.relu(jnp.einsum('nhwc,cd->nhwd', h1, w2) + b2[0])
    dens = jnp.einsum('nhwc,cd->nhwd', h2, w3) + b3[0]
    dens_nchw = jnp.transpose(dens, (0, 3, 1, 2))
    loss = jnp.mean((jnp.squeeze(dens_nchw) - jnp.squeeze(dot_map)) ** 2)
    return dens_nchw, loss


if __name__ == "__main__":
    N, Cin, H, W = 2, 4, 16, 16
    C1, C2 = 32, 16

    key = jax.random.PRNGKey(0)
    k = jax.random.split(key, 6)

    img = jax.random.normal(k[0], (N, Cin, H, W), jnp.float32)
    dot_map = jax.random.uniform(k[1], (N, H, W), jnp.float32)

    # Deterministic synthetic parameters for the CCN backbone.
    w1 = 0.1 * jax.random.normal(k[2], (3, 3, Cin, C1), jnp.float32)
    b1 = 0.01 * jnp.ones((1, C1), jnp.float32)
    w2 = 0.1 * jax.random.normal(k[3], (C1, C2), jnp.float32)
    b2 = 0.01 * jnp.ones((1, C2), jnp.float32)
    w3 = 0.1 * jax.random.normal(k[4], (C2, 1), jnp.float32)
    b3 = 0.01 * jnp.ones((1, 1), jnp.float32)
    params = (w1, b1, w2, b2, w3, b3)

    density_map, dot_out, loss = crowd_counter_forward(img, dot_map, params)
    jax.block_until_ready((density_map, dot_out, loss))

    ref_dens, ref_loss = _reference(img, dot_map, params)
    assert density_map.shape == (N, 1, H, W)
    assert dot_out.shape == (N, H, W)
    assert bool(jnp.allclose(density_map, ref_dens, atol=1e-3, rtol=1e-3))
    assert bool(jnp.allclose(loss, ref_loss, atol=1e-4, rtol=1e-4))

    print("KERNEL_OK")
</pallas_src>

<mosaic_0001>
module attributes {stable_mosaic.version = 11 : i64} {
  func.func @_ccn_mse_kernel(%arg0: i32, %arg1: memref<1x4x512xf32, #tpu.memory_space<vmem>>, %arg2: memref<1x1x384xf32, #tpu.memory_space<vmem>>, %arg3: memref<1x1x384xf32, #tpu.memory_space<vmem>>, %arg4: memref<32x36xf32, #tpu.memory_space<vmem>>, %arg5: memref<32x1xf32, #tpu.memory_space<vmem>>, %arg6: memref<16x32xf32, #tpu.memory_space<vmem>>, %arg7: memref<16x1xf32, #tpu.memory_space<vmem>>, %arg8: memref<16x1xf32, #tpu.memory_space<vmem>>, %arg9: memref<1x1xf32, #tpu.memory_space<vmem>>, %arg10: memref<1x1x384xf32, #tpu.memory_space<vmem>>, %arg11: memref<1x1x128xf32, #tpu.memory_space<vmem>>) attributes {dimension_semantics = [#tpu.dimension_semantics<parallel>], iteration_bounds = array<i64: 2>, scalar_prefetch = 0 : i64, scratch_operands = 0 : i64, tpu.core_type = #tpu.core_type<tc>, window_params = [{transform_indices = @transform_0, window_bounds = array<i64: 1, 4, 512>}, {transform_indices = @transform_1, window_bounds = array<i64: 1, 1, 384>}, {transform_indices = @transform_2, window_bounds = array<i64: 1, 1, 384>}, {pipeline_mode = #tpu.pipeline_mode<synchronous>, transform_indices = @transform_3, window_bounds = array<i64: 32, 36>}, {pipeline_mode = #tpu.pipeline_mode<synchronous>, transform_indices = @transform_4, window_bounds = array<i64: 32, 1>}, {pipeline_mode = #tpu.pipeline_mode<synchronous>, transform_indices = @transform_5, window_bounds = array<i64: 16, 32>}, {pipeline_mode = #tpu.pipeline_mode<synchronous>, transform_indices = @transform_6, window_bounds = array<i64: 16, 1>}, {pipeline_mode = #tpu.pipeline_mode<synchronous>, transform_indices = @transform_7, window_bounds = array<i64: 16, 1>}, {pipeline_mode = #tpu.pipeline_mode<synchronous>, transform_indices = @transform_8, window_bounds = array<i64: 1, 1>}, {transform_indices = @transform_9, window_bounds = array<i64: 1, 1, 384>}, {transform_indices = @transform_10, window_bounds = array<i64: 1, 1, 128>}]} {
    %c0 = arith.constant 0 : index
    %c0_0 = arith.constant 0 : index
    %c0_1 = arith.constant 0 : index
    %0 = vector.load %arg1[%c0, %c0_0, %c0_1] : memref<1x4x512xf32, #tpu.memory_space<vmem>>, vector<1x4x512xf32>
    %1 = vector.shape_cast %0 : vector<1x4x512xf32> to vector<4x512xf32>
    %cst = arith.constant 0.000000e+00 : f32
    %2 = vector.broadcast %cst : f32 to vector<32x384xf32>
    %3 = vector.extract_strided_slice %1 {offsets = [0, 0], sizes = [4, 384], strides = [1, 1]} : vector<4x512xf32> to vector<4x384xf32>
    %c0_2 = arith.constant 0 : index
    %c0_3 = arith.constant 0 : index
    %4 = vector.load %arg4[%c0_2, %c0_3] : memref<32x36xf32, #tpu.memory_space<vmem>>, vector<32x4xf32>
    %cst_4 = arith.constant dense<0.000000e+00> : vector<32x384xf32>
    %5 = tpu.matmul %4, %3, %cst_4 {dimension_numbers = #tpu.dot_dimension_numbers<[1], [0], [0], [1], [0, 0, 1, 1], [], []>} : vector<32x4xf32>, vector<4x384xf32>, vector<32x384xf32> -> vector<32x384xf32>
    %6 = arith.addf %2, %5 : vector<32x384xf32>
    %7 = vector.extract_strided_slice %1 {offsets = [0, 1], sizes = [4, 384], strides = [1, 1]} : vector<4x512xf32> to vector<4x384xf32>
    %c0_5 = arith.constant 0 : index
    %c4 = arith.constant 4 : index
    %8 = vector.load %arg4[%c0_5, %c4] : memref<32x36xf32, #tpu.memory_space<vmem>>, vector<32x4xf32>
    %cst_6 = arith.constant dense<0.000000e+00> : vector<32x384xf32>
    %9 = tpu.matmul %8, %7, %cst_6 {dimension_numbers = #tpu.dot_dimension_numbers<[1], [0], [0], [1], [0, 0, 1, 1], [], []>} : vector<32x4xf32>, vector<4x384xf32>, vector<32x384xf32> -> vector<32x384xf32>
    %10 = arith.addf %6, %9 : vector<32x384xf32>
    %11 = vector.extract_strided_slice %1 {offsets = [0, 2], sizes = [4, 384], strides = [1, 1]} : vector<4x512xf32> to vector<4x384xf32>
    %c0_7 = arith.constant 0 : index
    %c8 = arith.constant 8 : index
    %12 = vector.load %arg4[%c0_7, %c8] : memref<32x36xf32, #tpu.memory_space<vmem>>, vector<32x4xf32>
    %cst_8 = arith.constant dense<0.000000e+00> : vector<32x384xf32>
    %13 = tpu.matmul %12, %11, %cst_8 {dimension_numbers = #tpu.dot_dimension_numbers<[1], [0], [0], [1], [0, 0, 1, 1], [], []>} : vector<32x4xf32>, vector<4x384xf32>, vector<32x384xf32> -> vector<32x384xf32>
    %14 = arith.addf %10, %13 : vector<32x384xf32>
    %15 = vector.extract_strided_slice %1 {offsets = [0, 18], sizes = [4, 384], strides = [1, 1]} : vector<4x512xf32> to vector<4x384xf32>
    %c0_9 = arith.constant 0 : index
    %c12 = arith.constant 12 : index
    %16 = vector.load %arg4[%c0_9, %c12] : memref<32x36xf32, #tpu.memory_space<vmem>>, vector<32x4xf32>
    %cst_10 = arith.constant dense<0.000000e+00> : vector<32x384xf32>
    %17 = tpu.matmul %16, %15, %cst_10 {dimension_numbers = #tpu.dot_dimension_numbers<[1], [0], [0], [1], [0, 0, 1, 1], [], []>} : vector<32x4xf32>, vector<4x384xf32>, vector<32x384xf32> -> vector<32x384xf32>
    %18 = arith.addf %14, %17 : vector<32x384xf32>
    %19 = vector.extract_strided_slice %1 {offsets = [0, 19], sizes = [4, 384], strides = [1, 1]} : vector<4x512xf32> to vector<4x384xf32>
    %c0_11 = arith.constant 0 : index
    %c16 = arith.constant 16 : index
    %20 = vector.load %arg4[%c0_11, %c16] : memref<32x36xf32, #tpu.memory_space<vmem>>, vector<32x4xf32>
    %cst_12 = arith.constant dense<0.000000e+00> : vector<32x384xf32>
    %21 = tpu.matmul %20, %19, %cst_12 {dimension_numbers = #tpu.dot_dimension_numbers<[1], [0], [0], [1], [0, 0, 1, 1], [], []>} : vector<32x4xf32>, vector<4x384xf32>, vector<32x384xf32> -> vector<32x384xf32>
    %22 = arith.addf %18, %21 : vector<32x384xf32>
    %23 = vector.extract_strided_slice %1 {offsets = [0, 20], sizes = [4, 384], strides = [1, 1]} : vector<4x512xf32> to vector<4x384xf32>
    %c0_13 = arith.constant 0 : index
    %c20 = arith.constant 20 : index
    %24 = vector.load %arg4[%c0_13, %c20] : memref<32x36xf32, #tpu.memory_space<vmem>>, vector<32x4xf32>
    %cst_14 = arith.constant dense<0.000000e+00> : vector<32x384xf32>
    %25 = tpu.matmul %24, %23, %cst_14 {dimension_numbers = #tpu.dot_dimension_numbers<[1], [0], [0], [1], [0, 0, 1, 1], [], []>} : vector<32x4xf32>, vector<4x384xf32>, vector<32x384xf32> -> vector<32x384xf32>
    %26 = arith.addf %22, %25 : vector<32x384xf32>
    %27 = vector.extract_strided_slice %1 {offsets = [0, 36], sizes = [4, 384], strides = [1, 1]} : vector<4x512xf32> to vector<4x384xf32>
    %c0_15 = arith.constant 0 : index
    %c24 = arith.constant 24 : index
    %28 = vector.load %arg4[%c0_15, %c24] : memref<32x36xf32, #tpu.memory_space<vmem>>, vector<32x4xf32>
    %cst_16 = arith.constant dense<0.000000e+00> : vector<32x384xf32>
    %29 = tpu.matmul %28, %27, %cst_16 {dimension_numbers = #tpu.dot_dimension_numbers<[1], [0], [0], [1], [0, 0, 1, 1], [], []>} : vector<32x4xf32>, vector<4x384xf32>, vector<32x384xf32> -> vector<32x384xf32>
    %30 = arith.addf %26, %29 : vector<32x384xf32>
    %31 = vector.extract_strided_slice %1 {offsets = [0, 37], sizes = [4, 384], strides = [1, 1]} : vector<4x512xf32> to vector<4x384xf32>
    %c0_17 = arith.constant 0 : index
    %c28 = arith.constant 28 : index
    %32 = vector.load %arg4[%c0_17, %c28] : memref<32x36xf32, #tpu.memory_space<vmem>>, vector<32x4xf32>
    %cst_18 = arith.constant dense<0.000000e+00> : vector<32x384xf32>
    %33 = tpu.matmul %32, %31, %cst_18 {dimension_numbers = #tpu.dot_dimension_numbers<[1], [0], [0], [1], [0, 0, 1, 1], [], []>} : vector<32x4xf32>, vector<4x384xf32>, vector<32x384xf32> -> vector<32x384xf32>
    %34 = arith.addf %30, %33 : vector<32x384xf32>
    %35 = vector.extract_strided_slice %1 {offsets = [0, 38], sizes = [4, 384], strides = [1, 1]} : vector<4x512xf32> to vector<4x384xf32>
    %c0_19 = arith.constant 0 : index
    %c32 = arith.constant 32 : index
    %36 = vector.load %arg4[%c0_19, %c32] : memref<32x36xf32, #tpu.memory_space<vmem>>, vector<32x4xf32>
    %cst_20 = arith.constant dense<0.000000e+00> : vector<32x384xf32>
    %37 = tpu.matmul %36, %35, %cst_20 {dimension_numbers = #tpu.dot_dimension_numbers<[1], [0], [0], [1], [0, 0, 1, 1], [], []>} : vector<32x4xf32>, vector<4x384xf32>, vector<32x384xf32> -> vector<32x384xf32>
    %38 = arith.addf %34, %37 : vector<32x384xf32>
    %c0_21 = arith.constant 0 : index
    %c0_22 = arith.constant 0 : index
    %39 = vector.load %arg5[%c0_21, %c0_22] : memref<32x1xf32, #tpu.memory_space<vmem>>, vector<32x1xf32>
    %40 = vector.broadcast %39 : vector<32x1xf32> to vector<32x384xf32>
    %41 = arith.addf %38, %40 : vector<32x384xf32>
    %cst_23 = arith.constant 0.000000e+00 : f32
    %42 = vector.broadcast %cst_23 : f32 to vector<32x384xf32>
    %43 = arith.maximumf %41, %42 : vector<32x384xf32>
    %c0_24 = arith.constant 0 : index
    %c0_25 = arith.constant 0 : index
    %44 = vector.load %arg6[%c0_24, %c0_25] : memref<16x32xf32, #tpu.memory_space<vmem>>, vector<16x32xf32>
    %cst_26 = arith.constant dense<0.000000e+00> : vector<16x384xf32>
    %45 = tpu.matmul %44, %43, %cst_26 {dimension_numbers = #tpu.dot_dimension_numbers<[1], [0], [0], [1], [0, 0, 1, 1], [], []>} : vector<16x32xf32>, vector<32x384xf32>, vector<16x384xf32> -> vector<16x384xf32>
    %c0_27 = arith.constant 0 : index
    %c0_28 = arith.constant 0 : index
    %46 = vector.load %arg7[%c0_27, %c0_28] : memref<16x1xf32, #tpu.memory_space<vmem>>, vector<16x1xf32>
    %47 = vector.broadcast %46 : vector<16x1xf32> to vector<16x384xf32>
    %48 = arith.addf %45, %47 : vector<16x384xf32>
    %cst_29 = arith.constant 0.000000e+00 : f32
    %49 = vector.broadcast %cst_29 : f32 to vector<16x384xf32>
    %50 = arith.maximumf %48, %49 : vector<16x384xf32>
    %c0_30 = arith.constant 0 : index
    %c0_31 = arith.constant 0 : index
    %51 = vector.load %arg8[%c0_30, %c0_31] : memref<16x1xf32, #tpu.memory_space<vmem>>, vector<16x1xf32>
    %52 = vector.broadcast %51 : vector<16x1xf32> to vector<16x384xf32>
    %53 = arith.mulf %52, %50 : vector<16x384xf32>
    %cst_32 = arith.constant dense<0.000000e+00> : vector<384xf32>
    %54 = vector.multi_reduction <add>, %53, %cst_32 [0] : vector<16x384xf32> to vector<384xf32>
    %55 = vector.shape_cast %54 : vector<384xf32> to vector<1x384xf32>
    %c0_33 = arith.constant 0 : index
    %c0_34 = arith.constant 0 : index
    %56 = vector.load %arg9[%c0_33, %c0_34] : memref<1x1xf32, #tpu.memory_space<vmem>>, vector<1x1xf32>
    %57 = vector.broadcast %56 : vector<1x1xf32> to vector<1x384xf32>
    %58 = arith.addf %55, %57 : vector<1x384xf32>
    %59 = vector.shape_cast %58 : vector<1x384xf32> to vector<1x1x384xf32>
    %c0_35 = arith.constant 0 : index
    %c0_36 = arith.constant 0 : index
    %c0_37 = arith.constant 0 : index
    %60 = vector.load %arg10[%c0_35, %c0_36, %c0_37] : memref<1x1x384xf32, #tpu.memory_space<vmem>>, vector<1x1x384xf32>
    tpu.vector_store %arg10[%c0_35, %c0_36, %c0_37], %59 {strides = array<i32>} : memref<1x1x384xf32, #tpu.memory_space<vmem>>, vector<1x1x384xf32>,
    %c0_38 = arith.constant 0 : index
    %c0_39 = arith.constant 0 : index
    %c0_40 = arith.constant 0 : index
    %61 = vector.load %arg2[%c0_38, %c0_39, %c0_40] : memref<1x1x384xf32, #tpu.memory_space<vmem>>, vector<1x1x384xf32>
    %62 = vector.shape_cast %61 : vector<1x1x384xf32> to vector<1x384xf32>
    %63 = arith.subf %58, %62 : vector<1x384xf32>
    %c0_41 = arith.constant 0 : index
    %c0_42 = arith.constant 0 : index
    %c0_43 = arith.constant 0 : index
    %64 = vector.load %arg3[%c0_41, %c0_42, %c0_43] : memref<1x1x384xf32, #tpu.memory_space<vmem>>, vector<1x1x384xf32>
    %65 = vector.shape_cast %64 : vector<1x1x384xf32> to vector<1x384xf32>
    %66 = arith.mulf %63, %65 : vector<1x384xf32>
    %67 = arith.mulf %66, %66 : vector<1x384xf32>
    %68 = vector.extract_strided_slice %67 {offsets = [0, 0], sizes = [1, 128], strides = [1, 1]} : vector<1x384xf32> to vector<1x128xf32>
    %69 = vector.extract_strided_slice %67 {offsets = [0, 128], sizes = [1, 128], strides = [1, 1]} : vector<1x384xf32> to vector<1x128xf32>
    %70 = arith.addf %68, %69 : vector<1x128xf32>
    %71 = vector.extract_strided_slice %67 {offsets = [0, 256], sizes = [1, 128], strides = [1, 1]} : vector<1x384xf32> to vector<1x128xf32>
    %72 = arith.addf %70, %71 : vector<1x128xf32>
    %73 = vector.shape_cast %72 : vector<1x128xf32> to vector<1x1x128xf32>
    %c0_44 = arith.constant 0 : index
    %c0_45 = arith.constant 0 : index
    %c0_46 = arith.constant 0 : index
    %74 = vector.load %arg11[%c0_44, %c0_45, %c0_46] : memref<1x1x128xf32, #tpu.memory_space<vmem>>, vector<1x1x128xf32>
    tpu.vector_store %arg11[%c0_44, %c0_45, %c0_46], %73 {strides = array<i32>} : memref<1x1x128xf32, #tpu.memory_space<vmem>>, vector<1x1x128xf32>,
    return
  }
  func.func @transform_0(%arg0: i32) -> (i32, i32, i32) {
    %c0_i32 = arith.constant 0 : i32
    %c0_i32_0 = arith.constant 0 : i32
    %c0_i32_1 = arith.constant 0 : i32
    return %arg0, %c0_i32, %c0_i32_0 : i32, i32, i32
  }
  func.func @transform_1(%arg0: i32) -> (i32, i32, i32) {
    %c0_i32 = arith.constant 0 : i32
    %c0_i32_0 = arith.constant 0 : i32
    %c0_i32_1 = arith.constant 0 : i32
    return %arg0, %c0_i32, %c0_i32_0 : i32, i32, i32
  }
  func.func @transform_2(%arg0: i32) -> (i32, i32, i32) {
    %c0_i32 = arith.constant 0 : i32
    %c0_i32_0 = arith.constant 0 : i32
    %c0_i32_1 = arith.constant 0 : i32
    return %arg0, %c0_i32, %c0_i32_0 : i32, i32, i32
  }
  func.func @transform_3(%arg0: i32) -> (i32, i32) {
    %c0_i32 = arith.constant 0 : i32
    %c0_i32_0 = arith.constant 0 : i32
    %c0_i32_1 = arith.constant 0 : i32
    return %c0_i32, %c0_i32_0 : i32, i32
  }
  func.func @transform_4(%arg0: i32) -> (i32, i32) {
    %c0_i32 = arith.constant 0 : i32
    %c0_i32_0 = arith.constant 0 : i32
    %c0_i32_1 = arith.constant 0 : i32
    return %c0_i32, %c0_i32_0 : i32, i32
  }
  func.func @transform_5(%arg0: i32) -> (i32, i32) {
    %c0_i32 = arith.constant 0 : i32
    %c0_i32_0 = arith.constant 0 : i32
    %c0_i32_1 = arith.constant 0 : i32
    return %c0_i32, %c0_i32_0 : i32, i32
  }
  func.func @transform_6(%arg0: i32) -> (i32, i32) {
    %c0_i32 = arith.constant 0 : i32
    %c0_i32_0 = arith.constant 0 : i32
    %c0_i32_1 = arith.constant 0 : i32
    return %c0_i32, %c0_i32_0 : i32, i32
  }
  func.func @transform_7(%arg0: i32) -> (i32, i32) {
    %c0_i32 = arith.constant 0 : i32
    %c0_i32_0 = arith.constant 0 : i32
    %c0_i32_1 = arith.constant 0 : i32
    return %c0_i32, %c0_i32_0 : i32, i32
  }
  func.func @transform_8(%arg0: i32) -> (i32, i32) {
    %c0_i32 = arith.constant 0 : i32
    %c0_i32_0 = arith.constant 0 : i32
    %c0_i32_1 = arith.constant 0 : i32
    return %c0_i32, %c0_i32_0 : i32, i32
  }
  func.func @transform_9(%arg0: i32) -> (i32, i32, i32) {
    %c0_i32 = arith.constant 0 : i32
    %c0_i32_0 = arith.constant 0 : i32
    %c0_i32_1 = arith.constant 0 : i32
    return %arg0, %c0_i32, %c0_i32_0 : i32, i32, i32
  }
  func.func @transform_10(%arg0: i32) -> (i32, i32, i32) {
    %c0_i32 = arith.constant 0 : i32
    %c0_i32_0 = arith.constant 0 : i32
    %c0_i32_1 = arith.constant 0 : i32
    return %arg0, %c0_i32, %c0_i32_0 : i32, i32, i32
  }
}

</mosaic_0001>

<bundles_post_ra>
// kernel: tpu_custom_call.1
= control target key start
LH: loop header
LB: loop body
LE: loop exit
PB: predicated region body
PF: predicated region fallthrough
CT: control target
= control target key end

     0   :  { %s3292_s0 = inlined_call_operand.vmem [shape: f32[2,4,512], index: 0, kind: input, shape index: {}]   ;;  %s3293_s1 = inlined_call_operand.hbm [shape: f32[2,1,384], index: 1, kind: input, shape index: {}]   ;;  %s3294_s2 = inlined_call_operand.vmem [shape: f32[2,1,384], index: 2, kind: input, shape index: {}]   ;;  %s3295_s3 = inlined_call_operand.vmem [shape: f32[32,36], index: 3, kind: input, shape index: {}]   ;;  %s3296_s4 = inlined_call_operand.vmem [shape: f32[32,1], index: 4, kind: input, shape index: {}]   ;;  %s3297_s5 = inlined_call_operand.hbm [shape: f32[16,32], index: 5, kind: input, shape index: {}]   ;;  %s3298_s6 = inlined_call_operand.vmem [shape: f32[16,1], index: 6, kind: input, shape index: {}]   ;;  %s3299_s7 = inlined_call_operand.vmem [shape: f32[16,1], index: 7, kind: input, shape index: {}]   ;;  %s3300_s8 = inlined_call_operand.<no memory space> [shape: f32[1,1], index: 8, kind: input, shape index: {}]   ;;  %s3301_s9 = inlined_call_operand.hbm [shape: f32[2,1,384], index: 9, kind: output, shape index: {0}]   ;;  %s3302_s10 = inlined_call_operand.hbm [shape: f32[2,1,128], index: 10, kind: output, shape index: {1}]  }
   0x1   :  { %3308 = sst [smem:[#allocation20_spill]] %s3297_s5  ;;  %v16_v0 = vstv %s3300_s8 }
   0x2   :  { %17 = vst [vmem:[#allocation2] sm:$0x1] %v16_v0 }
   0x3   :  { %18 = vsyncpa [#allocation4], 0 }
   0x4   :  { %20 = vsyncpa [#allocation4 + $0x1], 0 }
   0x5   :  { %21 = vsyncpa [#allocation7], 0 }
   0x6   :  { %22 = vsyncpa [#allocation5], 0 }
   0x7   :  { %24 = vsyncpa [#allocation5 + $0x1], 0 }
   0x8   :  { %25 = vsyncpa [#allocation10], 0 }
   0x9   :  { %27 = vsyncpa [#allocation10 + $0x1], 0  ;;  %s2611_s15 = smov 0   ;;  %s2613_s16 = smov 0  }
   0xa   :  { %s2615_s17 = smov 0   ;;  %s2617_s18 = smov 0  }
   0xb LB: > { %3309 = sst [smem:[#allocation15_spill]] %s2528_s17  ;;  %s2635_s21 = sadd.s32 4294967295, %s2532_s18   ;;  %s2532_s18 = sphi %s2617_s18, %s3323_s18   ;;  %s2528_s17 = sphi %s2615_s17, %s3325_s17   ;;  %s2524_s16 = sphi %s2613_s16, %s3327_s16   ;;  %s2520_s15 = sphi %s2611_s15, %s3326_s15  }
   0xc   : > { %3310 = sst [smem:[#allocation16_spill]] %s2532_s18  ;;  %p2130_p0 = scmp.ge.s32.totalorder %s2532_s18, 1 }
   0xd   : > { %s3311_s5 = sld [smem:[#allocation20_spill]]  ;;  %p80_p1 = scmp.eq.s32.totalorder %s2635_s21, 0 }
   0xe   : > { %p294_p2 = scmp.lt.s32.totalorder %s2532_s18, 3  ;;  %s2534_s23 = smov [#allocation6]  }
   0xf   : > { %s313_s24 = sshll.u32 %s2534_s23, 4  ;;  %s2535_s25 = smov 128   ;;  %s314_s24 = int_to_ptr.vmem [resolvable:$true] %s313_s24 }
  0x10   : > { %p2640_p3 = pnand %p2130_p0, %p294_p2  ;;  %s2536_s26 = smov 8  }
  0x11   : > { %s2129_s27 = sadd.s32 4294967294, %s2532_s18   ;;  %s2651_s28 = sadd.s32 1, %s2532_s18  }
  0x12   : > { %p2297_p4 = pneg %p2640_p3  ;;  %3313 = sst [smem:[#allocation17_spill]] %s2651_s28 }
  0x13   : > { %s311_s20 = sshll.u32 %s3311_s5, 4  ;;  %s66_s29 = sadd.s32 1, %s2528_s17  ;;  %s312_s20 = int_to_ptr.hbm [resolvable:$true] %s311_s20 }
  0x14   : > { %p2298_p6 = pnand %p2297_p4, %p80_p1  ;;  %s63_s30 = ssub.s32 %s2532_s18, %s2651_s28 }
  0x15   : > { %p73_p7 = scmp.ne.s32.totalorder %s2528_s17, %s2524_s16  ;;  %p64_p8 = scmp.eq.s32.totalorder %s63_s30, 0 }
  0x16   : > { %2300 = dma.hbm_to_vmem [thread:$0]  (!%p2298_p6), %s312_s20, 256, %s314_s24, [#allocation7], %s2535_s25, %s2535_s25, %s2536_s26  }
  0x17   : > { %p74_p9 = scmp.eq.s32.totalorder %s2532_s18, 0  ;;  %p79_p10 = scmp.ne.s32.totalorder %s2524_s16, %s2520_s15 }
  0x18   : > { %p255_p11 = scmp.eq.s32.totalorder %s2635_s21, 1  ;;  %p261_p2 = scmp.eq.s32.totalorder %s2129_s27, 1 }
  0x19   : > { %s2663_s11 = scalar_select %p64_p8, %s2528_s17, %s66_s29  }
  0x1a   : > { %p75_p12 = por %p74_p9, %p73_p7  ;;  %p2667_p13 = por %p80_p1, %p79_p10 }
  0x1b   : > { %3314 = sst [smem:[#allocation18_spill]] %s2663_s11  ;;  %p2671_p0 = por %p255_p11, %p73_p7 }
  0x1c   : > { %p2313_p4 = scmp.lt.s32.totalorder %s2532_s18, 2  ;;  %s344_s14 = sand.u32 1, %s2528_s17  }
  0x1d   : > { %p2677_p6 = por %p261_p2, %p79_p10  ;;  %s2282_s19 = smul.u32 3, %s344_s14 }
  0x1e   : > { %p2681_p8 = pnand %p2313_p4, %p75_p12  ;;  %s2283_s23 = smul.u32 3, %s2532_s18 }
  0x1f   : > { %s3317_s8 = scalar_select %p2677_p6, 1, 0 }
  0x20   : > { %s352_s26 = scalar_lea.hbm %s3293_s1, %s2283_s23  ;;  %s348_s29 = scalar_lea.vmem [#allocation3], %s2282_s19 }
  0x21   : > { %3318 = sst [smem:[#allocation19_spill]] %s3317_s8  ;;  %s356_s30 = sshll.u32 %s348_s29, 4  ;;  %s357_s30 = int_to_ptr.vmem [resolvable:$true] %s356_s30 }
  0x22   : > { %s354_s27 = sshll.u32 %s352_s26, 4  ;;  %s345_s5 = scalar_lea.sflag [#allocation4], %s344_s14  ;;  %s355_s27 = int_to_ptr.hbm [resolvable:$true] %s354_s27 }
  0x23   : > { %s2400_s11 = sshra.s32 %s355_s27, 4  ;;  %p2404_p9 = pneg %p2681_p8  ;;  %s2401_s11 = int_to_ptr.hbm [resolvable:$true] %s2400_s11 }
  0x24   : > { %s2402_s17 = scalar_lea.hbm %s2401_s11, 3  ;;  %s2407_s8 = scalar_lea.hbm %s3293_s1, 6 }
  0x25   : > { %p2403_p7 = scmp.ne.s32.totalorder %s2401_s11, %s2402_s17  ;;  %p2408_p12 = scmp.lt.s32.totalorder %s2401_s11, %s3293_s1 }
  0x26   : > { %p2409_p2 = scmp.lt.s32.totalorder %s2407_s8, %s2402_s17 }
  0x27   : > { %p2405_p10 = pnand %p2404_p9, %p2403_p7 }
  0x28   : > { %p2410_p4 = por %p2409_p2, %p2408_p12 }
  0x29   : > { %p2406_p11 = pneg %p2405_p10 }
  0x2b   : > { %p2411_p5 = pnand %p2410_p4, %p2406_p11 }
  0x2d   : > { %2414 = shalt.err (!%p2411_p5)
}
  0x2e   : > { %2304 = dma.hbm_to_vmem [thread:$0]  (!%p2681_p8), %s355_s27, 48, %s357_s30, %s345_s5  }
  0x2f   : > { %372 = sbr.rel (%p2640_p3) target bundleno = 739 (0x2e3), region = 56  ;;  %s2702_s14 = sand.u32 (!%p2640_p3), 1, %s2524_s16  }
  0x30   : > { %s2284_s18 = smul.u32 (!%p2640_p3), 3, %s2702_s14  ;;  %s375_s28 = scalar_lea.sflag (!%p2640_p3), [#allocation4], %s2702_s14 }
  0x32   : > { %s2708_s17 = scalar_lea.vmem (!%p2640_p3), [#allocation3], %s2284_s18 }
  0x34   : > { %2503 = dma.done.wait (%p2667_p13), %s375_s28, 48  }
  0x35   : > { %2505 = vsyncadd (%p2667_p13), %s375_s28, 4294967248 }
  0x36   : > { %2507 = dma.done.wait (%p80_p1), [#allocation7], 256  }
  0x37   : > { %2509 = vsyncadd (%p80_p1), [#allocation7], 4294967040  ;;  %p434_p3 = scmp.lt.s32.totalorder %s2635_s21, 1  ;;  %v2731_v2 = vld [vmem:[%s3295_s3] sm:$0xff]  ;;  %s2537_s25 = smov 124   ;;  %v2741_v4 = vld [vmem:[%s3295_s3 + $0x18] sm:$0xff] }
  0x38   : > { %453 = vrot.lane.b32.xlu1 %v2731_v2, %s2537_s25  ;;  %s2538_s30 = smov 127   ;;  %v2749_v9 = vld [vmem:[%s3295_s3 + $0x10] sm:$0xff]  ;;  %v2758_v12 = vld [vmem:[%s3295_s3 + $0x8] sm:$0xff]  ;;  %s2540_s11 = smov 126   ;;  %vm491_vm0 = vcmask 1043456   ;;  %vm482_vm1 = vcmask 31744  }
  0x39   : > { %s2720_s5 = scalar_select %p434_p3, %s2635_s21, 1  ;;  %vm478_vm2 = vcmask 1039360   ;;  %vm723_vm3 = vcmask 1031168   ;;  %vm871_vm4 = vcmask 900096   ;;  %vm1019_vm5 = vcmask 891904  }
  0x3a   : > { %s2541_s8 = smov 110   ;;  %s2543_s12 = smov 109   ;;  %vm1167_vm6 = vcmask 883712   ;;  %vm1315_vm7 = vcmask 752640   ;;  %vm1463_vm8 = vcmask 744448   ;;  %vm1611_vm9 = vcmask 736256  }
  0x3b   : > { %s2280_s22 = sshll.u32 %s2720_s5, 4  ;;  %s2544_s20 = smov 112   ;;  %vm1790_vm10 = vcmask 261120   ;;  %vm1926_vm11 = vcmask 1040384   ;;  %vm1928_vm12 = vcmask 1041408  }
  0x3c   : > { %s438_s19 = scalar_lea.vmem %s3292_s0, %s2280_s22  ;;  %s2539_s22 = smov 120  }
  0x3d   : > { %v2726_v1 = vld [vmem:[%s438_s19] sm:$0xff]  ;;  %v2735_v3 = vld [vmem:[%s438_s19 + $0x8] sm:$0xff]  ;;  %s2542_s19 = smov 116   ;;  %s2546_s26 = smov 92  }
  0x3e   : > { %463 = vst [vmem:[#allocation1] ss:$2 sm:$0xff] %v2726_v1  ;;  %s2547_s29 = smov 104   ;;  %s2549_s27 = smov 100  }
  0x3f   : > { %465 = vst [vmem:[#allocation1 + $0x10] ss:$2 sm:$0xff] %v2735_v3  ;;  %s2550_s24 = smov 90   ;;  %s2551_s23 = smov 96  }
  0x40   : > { %459 = vrot.lane.b32.xlu1 %v2741_v4, %s2537_s25 }
  0x45   : > { %v466_v5 = vld.sshfl [vmem:[#allocation1] sm:$0xff pattern:$0x75316420]  ;;  %v467_v6 = vld.sshfl [vmem:[#allocation1 + $0x8] sm:$0xff pattern:$0x75316420] }
  0x46   : > { %470 = vrot.lane.b32.xlu0 %v466_v5, %s2538_s30  ;;  %585 = vst [vmem:[#allocation1] ss:$2 sm:$0xff] %v2726_v1  ;;  %v469_v7 = vld.sshfl [vmem:[#allocation1 + $0x18] sm:$0xff pattern:$0x75316420] }
  0x47   : > { %v468_v8 = vld.sshfl [vmem:[#allocation1 + $0x10] sm:$0xff pattern:$0x75316420] }
  0x48   : > { %474 = vrot.lane.b32.xlu2 %v468_v8, %s2538_s30  ;;  %587 = vst [vmem:[#allocation1 + $0x10] ss:$2 sm:$0xff] %v2735_v3  ;;  %457 = vrot.lane.b32.xlu1 %v2749_v9, %s2537_s25 }
  0x4d   : > { %v588_v10 = vld.sshfl [vmem:[#allocation1] sm:$0xff pattern:$0x75316420]  ;;  %v2751_v11 = vld.sshfl [vmem:[#allocation1 + $0x8] sm:$0xff pattern:$0x75316420] }
  0x4e   : > { %472 = vrot.lane.b32.xlu0 %v467_v6, %s2538_s30  ;;  %708 = vst [vmem:[#allocation1] ss:$2 sm:$0xff] %v2726_v1  ;;  %2152 = vmatpush.msk.msra.mxu3 %vm491_vm0, %v588_v10 }
  0x4f   : > { %v2760_v13 = vld.sshfl [vmem:[#allocation1 + $0x10] sm:$0xff pattern:$0x75316420]  ;;  %2153 = vmatmul.msk.f32.vlgmr.msra.gmra.mxu3 %vm482_vm1, %v2731_v2 }
  0x50   : > { %710 = vst [vmem:[#allocation1 + $0x10] ss:$2 sm:$0xff] %v2735_v3  ;;  %455 = vrot.lane.b32.xlu2 %v2758_v12, %s2537_s25  ;;  %700 = vrot.lane.b32.xlu1 %v2731_v2, %s2539_s22  ;;  %s2545_s25 = smov 108  }
  0x55   : > { %v712_v14 = vld.sshfl [vmem:[#allocation1 + $0x8] sm:$0xff pattern:$0x75316420]  ;;  %v711_v15 = vld.sshfl [vmem:[#allocation1] sm:$0xff pattern:$0x75316420] }
  0x56   : > { %476 = vrot.lane.b32.xlu0 %v469_v7, %s2538_s30  ;;  %856 = vst [vmem:[#allocation1] ss:$2 sm:$0xff] %v2726_v1  ;;  %s2548_s30 = smov 91  }
  0x57   : > { %v713_v16 = vld.sshfl [vmem:[#allocation1 + $0x10] sm:$0xff pattern:$0x75316420]  ;;  %v714_v17 = vld.sshfl [vmem:[#allocation1 + $0x18] sm:$0xff pattern:$0x75316420]  ;;  %2154 = vmatmul.msk.f32.gmra.mxu3 %vm482_vm1, %v2758_v12 }
  0x58   : > { %858 = vst [vmem:[#allocation1 + $0x10] ss:$2 sm:$0xff] %v2735_v3  ;;  %715 = vrot.lane.b32.xlu2 %v711_v15, %s2540_s11  ;;  %721 = vrot.lane.b32.xlu1 %v714_v17, %s2540_s11 }
  0x5d   : > { %v859_v18 = vld.sshfl [vmem:[#allocation1] sm:$0xff pattern:$0x75316420]  ;;  %v860_v19 = vld.sshfl [vmem:[#allocation1 + $0x8] sm:$0xff pattern:$0x75316420] }
  0x5e   : > { %717 = vrot.lane.b32.xlu0 %v712_v14, %s2540_s11  ;;  %1004 = vst [vmem:[#allocation1] ss:$2 sm:$0xff] %v2726_v1 }
  0x5f   : > { %v861_v20 = vld.sshfl [vmem:[#allocation1 + $0x10] sm:$0xff pattern:$0x75316420]  ;;  %v862_v21 = vld.sshfl [vmem:[#allocation1 + $0x18] sm:$0xff pattern:$0x75316420]  ;;  %2155 = vmatmul.msk.f32.gmra.mxu3 %vm482_vm1, %v2749_v9 }
  0x60   : > { %702 = vrot.lane.b32.xlu2 %v2758_v12, %s2539_s22  ;;  %863 = vrot.lane.b32.xlu1 %v859_v18, %s2541_s8  ;;  %1006 = vst [vmem:[#allocation1 + $0x10] ss:$2 sm:$0xff] %v2735_v3 }
  0x65   : > { %v1007_v22 = vld.sshfl [vmem:[#allocation1] sm:$0xff pattern:$0x75316420]  ;;  %v1008_v23 = vld.sshfl [vmem:[#allocation1 + $0x8] sm:$0xff pattern:$0x75316420] }
  0x66   : > { %719 = vrot.lane.b32.xlu0 %v713_v16, %s2540_s11  ;;  %1152 = vst [vmem:[#allocation1] ss:$2 sm:$0xff] %v2726_v1  ;;  %s2285_s11 = smul.u32 3, %s2720_s5 }
  0x67   : > { %v1010_v24 = vld.sshfl [vmem:[#allocation1 + $0x18] sm:$0xff pattern:$0x75316420]  ;;  %v1009_v25 = vld.sshfl [vmem:[#allocation1 + $0x10] sm:$0xff pattern:$0x75316420]  ;;  %2156 = vmatmul.msk.f32.gmra.mxu3 %vm482_vm1, %v2741_v4 }
  0x68   : > { %704 = vrot.lane.b32.xlu2 %v2749_v9, %s2539_s22  ;;  %867 = vrot.lane.b32.xlu1 %v861_v20, %s2541_s8  ;;  %1154 = vst [vmem:[#allocation1 + $0x10] ss:$2 sm:$0xff] %v2735_v3 }
  0x6d   : > { %v1155_v26 = vld.sshfl [vmem:[#allocation1] sm:$0xff pattern:$0x75316420]  ;;  %v1156_v27 = vld.sshfl [vmem:[#allocation1 + $0x8] sm:$0xff pattern:$0x75316420] }
  0x6e   : > { %706 = vrot.lane.b32.xlu0 %v2741_v4, %s2539_s22  ;;  %1300 = vst [vmem:[#allocation1] ss:$2 sm:$0xff] %v2726_v1 }
  0x6f   : > { %v1157_v28 = vld.sshfl [vmem:[#allocation1 + $0x10] sm:$0xff pattern:$0x75316420]  ;;  %v1158_v29 = vld.sshfl [vmem:[#allocation1 + $0x18] sm:$0xff pattern:$0x75316420] }
  0x70   : > { %865 = vrot.lane.b32.xlu2 %v860_v19, %s2541_s8  ;;  %1013 = vrot.lane.b32.xlu1 %v1008_v23, %s2543_s12  ;;  %1302 = vst [vmem:[#allocation1 + $0x10] ss:$2 sm:$0xff] %v2735_v3 }
  0x75   : > { %v1303_v31 = vld.sshfl [vmem:[#allocation1] sm:$0xff pattern:$0x75316420]  ;;  %v1304_v32 = vld.sshfl [vmem:[#allocation1 + $0x8] sm:$0xff pattern:$0x75316420] }
  0x76   : > { %848 = vrot.lane.b32.xlu0 %v2731_v2, %s2542_s19  ;;  %1448 = vst [vmem:[#allocation1] ss:$2 sm:$0xff] %v2726_v1 }
  0x77   : > { %v1306_v38 = vld.sshfl [vmem:[#allocation1 + $0x18] sm:$0xff pattern:$0x75316420]  ;;  %v1305_v39 = vld.sshfl [vmem:[#allocation1 + $0x10] sm:$0xff pattern:$0x75316420] }
  0x78   : > { %850 = vrot.lane.b32.xlu2 %v2758_v12, %s2542_s19  ;;  %854 = vrot.lane.b32.xlu1 %v2741_v4, %s2542_s19  ;;  %1450 = vst [vmem:[#allocation1 + $0x10] ss:$2 sm:$0xff] %v2735_v3 }
  0x7d   : > { %v1451_v45 = vld.sshfl [vmem:[#allocation1] sm:$0xff pattern:$0x75316420]  ;;  %v1452_v50 = vld.sshfl [vmem:[#allocation1 + $0x8] sm:$0xff pattern:$0x75316420] }
  0x7e   : > { %1011 = vrot.lane.b32.xlu0 %v1007_v22, %s2543_s12  ;;  %1596 = vst [vmem:[#allocation1] ss:$2 sm:$0xff] %v2726_v1 }
  0x7f   : > { %v2823_v46 = vld.sshfl [vmem:[#allocation1 + $0x18] sm:$0xff pattern:$0x75316420]  ;;  %v1453_v49 = vld.sshfl [vmem:[#allocation1 + $0x10] sm:$0xff pattern:$0x75316420] }
  0x80   : > { %852 = vrot.lane.b32.xlu2 %v2749_v9, %s2542_s19  ;;  %1015 = vrot.lane.b32.xlu1 %v1009_v25, %s2543_s12  ;;  %1598 = vst [vmem:[#allocation1 + $0x10] ss:$2 sm:$0xff] %v2735_v3 }
  0x85   : > { %v1600_v57 = vld.sshfl [vmem:[#allocation1 + $0x8] sm:$0xff pattern:$0x75316420]  ;;  %v1599_v58 = vld.sshfl [vmem:[#allocation1] sm:$0xff pattern:$0x75316420] }
  0x86   : > { %996 = vrot.lane.b32.xlu0 %v2731_v2, %s2544_s20 }
  0x87   : > { %v1601_v7 = vld.sshfl [vmem:[#allocation1 + $0x10] sm:$0xff pattern:$0x75316420] }
  0x88   : > { %998 = vrot.lane.b32.xlu2 %v2758_v12, %s2544_s20  ;;  %1002 = vrot.lane.b32.xlu1 %v2741_v4, %s2544_s20 }
  0x8e   : > { %869 = vrot.lane.b32.xlu0 %v862_v21, %s2541_s8 }
  0x90   : > { %1000 = vrot.lane.b32.xlu2 %v2749_v9, %s2544_s20  ;;  %1144 = vrot.lane.b32.xlu1 %v2731_v2, %s2545_s25  ;;  %s2286_s20 = smul.u32 3, %s2635_s21 }
  0x96   : > { %1017 = vrot.lane.b32.xlu0 %v1010_v24, %s2543_s12  ;;  %s442_s12 = scalar_lea.vmem %s3294_s2, %s2285_s11  ;;  %s1965_s11 = scalar_lea.sflag [#allocation5], %s2702_s14 }
  0x98   : > { %1161 = vrot.lane.b32.xlu2 %v1156_v27, %s2545_s25  ;;  %1165 = vrot.lane.b32.xlu1 %v1158_v29, %s2545_s25 }
  0x9e   : > { %1163 = vrot.lane.b32.xlu0 %v1157_v28, %s2545_s25 }
  0xa0   : > { %1146 = vrot.lane.b32.xlu2 %v2758_v12, %s2545_s25  ;;  %1309 = vrot.lane.b32.xlu1 %v1304_v32, %s2546_s26 }
  0xa2   : > { %v475_v30 = vpop.permute.xlu2 %474 }
  0xa6   : > { %1159 = vrot.lane.b32.xlu0 %v1155_v26, %s2545_s25 }
  0xa8   : > { %1148 = vrot.lane.b32.xlu2 %v2749_v9, %s2545_s25  ;;  %1294 = vrot.lane.b32.xlu1 %v2758_v12, %s2547_s29 }
  0xaa   : > { %v454_v33 = vpop.permute.xlu1 %453  ;;  %v456_v34 = vpop.permute.xlu2 %455 }
  0xae   : > { %1307 = vrot.lane.b32.xlu0 %v1303_v31, %s2546_s26 }
  0xb0   : > { %1292 = vrot.lane.b32.xlu2 %v2731_v2, %s2547_s29  ;;  %1296 = vrot.lane.b32.xlu1 %v2749_v9, %s2547_s29 }
  0xb2   : > { %v2804_v36 = vpop.permute.xlu1 %459  ;;  %v716_v37 = vpop.permute.xlu2 %715 }
  0xb6   : > { %1150 = vrot.lane.b32.xlu0 %v2741_v4, %s2545_s25  ;;  %s1979_s25 = scalar_lea.hbm %s3301_s9, %s2286_s20  ;;  %s2450_s20 = scalar_lea.hbm %s3301_s9, 6 }
  0xb8   : > { %v471_v35 = vpop.permute.xlu0 %470  ;;  %1311 = vrot.lane.b32.xlu2 %v1305_v39, %s2546_s26  ;;  %1457 = vrot.lane.b32.xlu1 %v1452_v50, %s2548_s30 }
  0xba   : > { %v458_v41 = vpop.permute.xlu1 %457  ;;  %v2810_v44 = vpop.permute.xlu2 %702 }
  0xbe   : > { %1313 = vrot.lane.b32.xlu0 %v1306_v38, %s2546_s26  ;;  %s427_s26 = scalar_lea.vmem [#allocation8], %s2284_s18  ;;  %s433_s18 = scalar_lea.vmem [#allocation9], %s2702_s14 }
  0xbf   : > { %s3246_s28 = sshll.u32 %s433_s18, 4  ;;  %s1995_s28 = int_to_ptr.vmem [resolvable:$true] %s3246_s28 }
  0xc0   : > { %v473_v40 = vpop.permute.xlu0 %472  ;;  %1298 = vrot.lane.b32.xlu2 %v2741_v4, %s2547_s29  ;;  %1442 = vrot.lane.b32.xlu1 %v2758_v12, %s2549_s27  ;;  %s1981_s29 = sshll.u32 %s427_s26, 4  ;;  %s1982_s29 = int_to_ptr.vmem [resolvable:$true] %s1981_s29 }
  0xc1   : > { %v479_v42 = vsel %vm478_vm2, %v471_v35, %v473_v40  ;;  %v480_v43 = vsel %vm478_vm2, %v473_v40, %v475_v30 }
  0xc2   : > { %2137 = vmatpush.msk.msra.mxu0 %vm491_vm0, %v479_v42  ;;  %2281 = vmatpush.msk.msra.mxu1 %vm491_vm0, %v479_v42  ;;  %v2826_v48 = vpop.permute.xlu1 %700  ;;  %v2829_v52 = vpop.permute.xlu2 %704 }
  0xc3   : > { %2138 = vmatmul.msk.f32.vlgmr.msra.gmra.mxu0 %vm482_vm1, %v454_v33  ;;  %2141 = vmatmul.msk.f32.vlgmr.msra.gmra.mxu1 %vm482_vm1, %v2804_v36 }
  0xc4   : > { %2142 = vmatpush.msk.msrb.mxu1 %vm491_vm0, %v480_v43  ;;  %2157 = vmatpush.msk.msrb.mxu0 %vm491_vm0, %v2751_v11 }
  0xc6   : > { %2162 = vmatpush.msk.msra.mxu1 %vm491_vm0, %v2760_v13  ;;  %1455 = vrot.lane.b32.xlu0 %v1451_v45, %s2548_s30 }
  0xc8   : > { %v477_v47 = vpop.permute.xlu0 %476  ;;  %1440 = vrot.lane.b32.xlu2 %v2731_v2, %s2549_s27  ;;  %1444 = vrot.lane.b32.xlu1 %v2749_v9, %s2549_s27 }
  0xc9   : > { %v481_v51 = vsel %vm478_vm2, %v475_v30, %v477_v47 }
  0xca   : > { %2147 = vmatpush.msk.msra.mxu2 %vm491_vm0, %v481_v51  ;;  %v722_v54 = vpop.permute.xlu1 %721  ;;  %v866_v56 = vpop.permute.xlu2 %865 }
  0xcb   : > { %2139 = vmatmul.msk.f32.gmra.mxu0 %vm482_vm1, %v456_v34  ;;  %2143 = vmatmul.msk.f32.vlgmr.msrb.gmra.mxu1 %vm482_vm1, %v454_v33 }
  0xcc   : > { %2148 = vmatmul.msk.f32.vlgmr.msra.gmra.mxu2 %vm482_vm1, %v454_v33 }
  0xce   : > { %1459 = vrot.lane.b32.xlu0 %v1453_v49, %s2548_s30 }
  0xd0   : > { %v718_v53 = vpop.permute.xlu0 %717  ;;  %1603 = vrot.lane.b32.xlu2 %v1599_v58, %s2550_s24  ;;  %1590 = vrot.lane.b32.xlu1 %v2758_v12, %s2551_s23 }
  0xd1   : > { %v724_v55 = vsel %vm723_vm3, %v716_v37, %v718_v53 }
  0xd2   : > { %2167 = vmatpush.msk.msrb.mxu2 %vm491_vm0, %v724_v55  ;;  %v864_v60 = vpop.permute.xlu1 %863  ;;  %v2852_v63 = vpop.permute.xlu2 %850 }
  0xd3   : > { %2140 = vmatmul.msk.f32.gmra.mxu0 %vm482_vm1, %v458_v41  ;;  %2144 = vmatmul.msk.f32.gmra.mxu1 %vm482_vm1, %v456_v34  ;;  %v872_v0 = vsel %vm871_vm4, %v864_v60, %v866_v56  ;;  %v3010_v47 = vpop.f32.mrf.mxu3 }
  0xd4   : > { %2149 = vmatmul.msk.f32.gmra.mxu2 %vm482_vm1, %v456_v34  ;;  %2182 = vmatpush.msk.msrb.mxu1 %vm491_vm0, %v872_v0 }
  0xd6   : > { %1605 = vrot.lane.b32.xlu0 %v1600_v57, %s2550_s24 }
  0xd8   : > { %v720_v59 = vpop.permute.xlu0 %719  ;;  %1588 = vrot.lane.b32.xlu2 %v2731_v2, %s2551_s23  ;;  %1592 = vrot.lane.b32.xlu1 %v2749_v9, %s2551_s23 }
  0xd9   : > { %v725_v61 = vsel %vm723_vm3, %v718_v53, %v720_v59  ;;  %v726_v62 = vsel %vm723_vm3, %v720_v59, %v722_v54 }
  0xda   : > { %2172 = vmatpush.msk.msrb.mxu3 %vm491_vm0, %v725_v61  ;;  %2177 = vmatpush.msk.msra.mxu0 %vm491_vm0, %v726_v62  ;;  %v868_v3 = vpop.permute.xlu1 %867  ;;  %v2872_v6 = vpop.permute.xlu2 %852 }
  0xdb   : > { %2145 = vmatmul.msk.f32.gmra.mxu1 %vm482_vm1, %v458_v41  ;;  %2158 = vmatmul.msk.f32.vlgmr.msrb.gmra.mxu0 %vm482_vm1, %v2731_v2  ;;  %v873_v5 = vsel %vm871_vm4, %v866_v56, %v868_v3  ;;  %v3027_v57 = vpop.f32.mrf.mxu3 }
  0xdc   : > { %2150 = vmatmul.msk.f32.gmra.mxu2 %vm482_vm1, %v458_v41  ;;  %2173 = vmatmul.msk.f32.vlgmr.msrb.gmra.mxu3 %vm482_vm1, %v2826_v48 }
  0xdd   : > { %2187 = vmatpush.msk.msra.mxu2 %vm491_vm0, %v873_v5 }
  0xde   : > { %1446 = vrot.lane.b32.xlu0 %v2741_v4, %s2549_s27 }
  0xe0   : > { %v2869_v1 = vpop.permute.xlu0 %706  ;;  %1461 = vrot.lane.b32.xlu2 %v2823_v46, %s2548_s30  ;;  %s1983_s30 = sshll.u32 %s1979_s25, 4  ;;  %s1984_s30 = int_to_ptr.hbm [resolvable:$true] %s1983_s30 }
  0xe1   : > { %s2444_s8 = sshra.s32 %s1984_s30, 4  ;;  %s2445_s8 = int_to_ptr.hbm [resolvable:$true] %s2444_s8 }
  0xe2   : > { %v1014_v10 = vpop.permute.xlu1 %1013  ;;  %v2887_v11 = vpop.permute.xlu2 %998  ;;  %s2446_s19 = scalar_lea.hbm %s2445_s8, 3  ;;  %p2451_p8 = scmp.lt.s32.totalorder %s2445_s8, %s3301_s9 }
  0xe3   : > { %2146 = vmatmul.msk.f32.gmra.mxu1 %vm482_vm1, %v2804_v36  ;;  %2159 = vmatmul.msk.f32.gmra.mxu0 %vm482_vm1, %v2758_v12  ;;  %v3050_v62 = vpop.f32.mrf.mxu3  ;;  %p2447_p1 = scmp.ne.s32.totalorder %s2445_s8, %s2446_s19  ;;  %p2452_p7 = scmp.lt.s32.totalorder %s2450_s20, %s2446_s19 }
  0xe4   : > { %2151 = vmatmul.msk.f32.gmra.mxu2 %vm482_vm1, %v2804_v36  ;;  %2174 = vmatmul.msk.f32.gmra.mxu3 %vm482_vm1, %v2810_v44 }
  0xe5   : > { %p2448_p5 = pnand %p2447_p1, %p2671_p0  ;;  %p2453_p9 = por %p2452_p7, %p2451_p8 }
  0xe6   : > { %1607 = vrot.lane.b32.xlu0 %v1601_v7, %s2550_s24 }
  0xe7   : > { %p2449_p13 = pneg %p2448_p5 }
  0xe8   : > { %v849_v8 = vpop.permute.xlu0 %848 }
  0xe9   : > { %p2454_p10 = pnand %p2453_p9, %p2449_p13 }
  0xea   : > { %v2899_v14 = vpop.permute.xlu1 %854  ;;  %v2902_v16 = vpop.permute.xlu2 %1000 }
  0xeb   : > { %2160 = vmatmul.msk.f32.gmra.mxu0 %vm482_vm1, %v2749_v9  ;;  %2163 = vmatmul.msk.f32.vlgmr.msra.gmra.mxu1 %vm482_vm1, %v2731_v2  ;;  %v3065_v5 = vpop.f32.mrf.mxu3 }
  0xec   : > { %2168 = vmatmul.msk.f32.vlgmr.msrb.gmra.mxu2 %vm482_vm1, %v2826_v48  ;;  %2175 = vmatmul.msk.f32.gmra.mxu3 %vm482_vm1, %v2829_v52 }
  0xee   : > { %1594 = vrot.lane.b32.xlu0 %v2741_v4, %s2551_s23  ;;  %s1992_s23 = scalar_lea.hbm %s3302_s10, %s2635_s21 }
  0xef   : > { %s3248_s22 = sshll.u32 %s1992_s23, 4  ;;  %s1997_s22 = int_to_ptr.hbm [resolvable:$true] %s3248_s22 }
  0xf0   : > { %v1012_v13 = vpop.permute.xlu0 %1011 }
  0xf1   : > { %v1020_v15 = vsel %vm1019_vm5, %v1012_v13, %v1014_v10 }
  0xf2   : > { %2197 = vmatpush.msk.msrb.mxu0 %vm491_vm0, %v1020_v15  ;;  %v1016_v17 = vpop.permute.xlu1 %1015  ;;  %v1162_v19 = vpop.permute.xlu2 %1161 }
  0xf3   : > { %2161 = vmatmul.msk.f32.gmra.mxu0 %vm482_vm1, %v2741_v4  ;;  %2164 = vmatmul.msk.f32.gmra.mxu1 %vm482_vm1, %v2758_v12  ;;  %v1021_v18 = vsel %vm1019_vm5, %v1014_v10, %v1016_v17 }
  0xf4   : > { %2169 = vmatmul.msk.f32.gmra.mxu2 %vm482_vm1, %v2810_v44  ;;  %2176 = vmatmul.msk.f32.gmra.mxu3 %vm482_vm1, %v2869_v1 }
  0xf5   : > { %2202 = vmatpush.msk.msra.mxu1 %vm491_vm0, %v1021_v18  ;;  %v2552_v18 = vmov 0  }
  0xf6   : > { %2367 = vset.pattern.permute.xlu1 %v2552_v18  ;;  %2369 = vset.pattern.permute.xlu0 %v2552_v18 }
  0xf7   : > { %2368 = vset.pattern.permute.xlu2 %v2552_v18 }
  0xf8   : > { %v2913_v2 = vpop.permute.xlu0 %996 }
  0xfa   : > { %v2924_v21 = vpop.permute.xlu1 %1002  ;;  %v2926_v22 = vpop.permute.xlu2 %1146 }
  0xfb   : > { %2165 = vmatmul.msk.f32.gmra.mxu1 %vm482_vm1, %v2749_v9  ;;  %2178 = vmatmul.msk.f32.vlgmr.msra.gmra.mxu0 %vm482_vm1, %v2826_v48  ;;  %v1602_v9 = vld.sshfl [vmem:[#allocation1 + $0x18] sm:$0xff pattern:$0x75316420] }
  0xfc   : > { %2170 = vmatmul.msk.f32.gmra.mxu2 %vm482_vm1, %v2829_v52  ;;  %1609 = vrot.lane.b32.xlu2 %v1602_v9, %s2550_s24 }
 0x100   : > { %v870_v12 = vpop.permute.xlu0 %869 }
 0x101   : > { %v874_v20 = vsel %vm871_vm4, %v868_v3, %v870_v12 }
 0x102   : > { %2192 = vmatpush.msk.msra.mxu3 %vm491_vm0, %v874_v20  ;;  %v2938_v25 = vpop.permute.xlu2 %1148 }
 0x103   : > { %2166 = vmatmul.msk.f32.gmra.mxu1 %vm482_vm1, %v2741_v4  ;;  %2179 = vmatmul.msk.f32.gmra.mxu0 %vm482_vm1, %v2810_v44  ;;  %v2944_v4 = vpop.permute.xlu1 %1144 }
 0x104   : > { %2171 = vmatmul.msk.f32.gmra.mxu2 %vm482_vm1, %v2869_v1  ;;  %2193 = vmatmul.msk.f32.vlgmr.msra.gmra.mxu3 %vm482_vm1, %v849_v8 }
 0x108   : > { %v1018_v23 = vpop.permute.xlu0 %1017 }
 0x109   : > { %v1022_v24 = vsel %vm1019_vm5, %v1016_v17, %v1018_v23 }
 0x10a   : > { %2207 = vmatpush.msk.msrb.mxu2 %vm491_vm0, %v1022_v24  ;;  %v2949_v28 = vpop.permute.xlu2 %1292 }
 0x10b   : > { %2180 = vmatmul.msk.f32.gmra.mxu0 %vm482_vm1, %v2829_v52  ;;  %2183 = vmatmul.msk.f32.vlgmr.msrb.gmra.mxu1 %vm482_vm1, %v849_v8  ;;  %v1166_v29 = vpop.permute.xlu1 %1165 }
 0x10c   : > { %2188 = vmatmul.msk.f32.vlgmr.msra.gmra.mxu2 %vm482_vm1, %v849_v8  ;;  %2194 = vmatmul.msk.f32.gmra.mxu3 %vm482_vm1, %v2852_v63 }
 0x110   : > { %v1164_v26 = vpop.permute.xlu0 %1163 }
 0x111   : > { %v1169_v27 = vsel %vm1167_vm6, %v1162_v19, %v1164_v26  ;;  %v1170_v30 = vsel %vm1167_vm6, %v1164_v26, %v1166_v29  ;;  %v1728_v26 = vld [vmem:[%s3296_s4] sm:$0xff] }
 0x112   : > { %2217 = vmatpush.msk.msra.mxu0 %vm491_vm0, %v1169_v27  ;;  %2222 = vmatpush.msk.msrb.mxu1 %vm491_vm0, %v1170_v30  ;;  %v1312_v33 = vpop.permute.xlu2 %1311 }
 0x113   : > { %2181 = vmatmul.msk.f32.gmra.mxu0 %vm482_vm1, %v2869_v1  ;;  %2184 = vmatmul.msk.f32.gmra.mxu1 %vm482_vm1, %v2852_v63  ;;  %v1310_v36 = vpop.permute.xlu1 %1309 }
 0x114   : > { %2189 = vmatmul.msk.f32.gmra.mxu2 %vm482_vm1, %v2852_v63  ;;  %2195 = vmatmul.msk.f32.gmra.mxu3 %vm482_vm1, %v2872_v6  ;;  %v1317_v38 = vsel %vm1315_vm7, %v1310_v36, %v1312_v33 }
 0x118   : > { %v1160_v31 = vpop.permute.xlu0 %1159 }
 0x119   : > { %v1168_v32 = vsel %vm1167_vm6, %v1160_v31, %v1162_v19  ;;  %v1731_v19 = vld [vmem:[%s3296_s4 + $0x18] sm:$0xff] }
 0x11a   : > { %2212 = vmatpush.msk.msrb.mxu3 %vm491_vm0, %v1168_v32  ;;  %v2970_v35 = vpop.permute.xlu2 %1298  ;;  %1749 = vperm.xlu1 %2367, %v1731_v19  }
 0x11b   : > { %2185 = vmatmul.msk.f32.gmra.mxu1 %vm482_vm1, %v2872_v6  ;;  %2198 = vmatmul.msk.f32.vlgmr.msrb.gmra.mxu0 %vm482_vm1, %v2913_v2  ;;  %v2988_v41 = vpop.permute.xlu1 %1294 }
 0x11c   : > { %2190 = vmatmul.msk.f32.gmra.mxu2 %vm482_vm1, %v2872_v6  ;;  %2196 = vmatmul.msk.f32.gmra.mxu3 %vm482_vm1, %v2899_v14 }
 0x11d   : > { %2232 = vmatpush.msk.msra.mxu3 %vm491_vm0, %v1317_v38 }
 0x120   : > { %v1308_v34 = vpop.permute.xlu0 %1307 }
 0x121   : > { %v1316_v37 = vsel %vm1315_vm7, %v1308_v34, %v1310_v36  ;;  %v1729_v34 = vld [vmem:[%s3296_s4 + $0x8] sm:$0xff] }
 0x122   : > { %2227 = vmatpush.msk.msra.mxu2 %vm491_vm0, %v1316_v37  ;;  %v2986_v40 = vpop.permute.xlu2 %1440  ;;  %1734 = vperm.xlu1 %2367, %v1728_v26  }
 0x123   : > { %2186 = vmatmul.msk.f32.gmra.mxu1 %vm482_vm1, %v2899_v14  ;;  %2199 = vmatmul.msk.f32.gmra.mxu0 %vm482_vm1, %v2887_v11  ;;  %v3008_v45 = vpop.permute.xlu1 %1296 }
 0x124   : > { %2191 = vmatmul.msk.f32.gmra.mxu2 %vm482_vm1, %v2899_v14  ;;  %2213 = vmatmul.msk.f32.vlgmr.msrb.gmra.mxu3 %vm482_vm1, %v2944_v4 }
 0x125   : > { %1739 = vperm.xlu0 %2369, %v1729_v34  }
 0x128   : > { %v2984_v39 = vpop.permute.xlu0 %1150 }
 0x12a   : > { %v1604_v44 = vpop.permute.xlu2 %1603 }
 0x12b   : > { %2200 = vmatmul.msk.f32.gmra.mxu0 %vm482_vm1, %v2902_v16  ;;  %2203 = vmatmul.msk.f32.vlgmr.msra.gmra.mxu1 %vm482_vm1, %v2913_v2  ;;  %v1458_v49 = vpop.permute.xlu1 %1457 }
 0x12c   : > { %2208 = vmatmul.msk.f32.vlgmr.msrb.gmra.mxu2 %vm482_vm1, %v2913_v2  ;;  %2214 = vmatmul.msk.f32.gmra.mxu3 %vm482_vm1, %v2926_v22 }
 0x130   : > { %v1314_v42 = vpop.permute.xlu0 %1313 }
 0x131   : > { %v1318_v43 = vsel %vm1315_vm7, %v1312_v33, %v1314_v42 }
 0x132   : > { %2237 = vmatpush.msk.msrb.mxu0 %vm491_vm0, %v1318_v43  ;;  %v3012_v48 = vpop.permute.xlu2 %1588 }
 0x133   : > { %2201 = vmatmul.msk.f32.gmra.mxu0 %vm482_vm1, %v2924_v21  ;;  %2204 = vmatmul.msk.f32.gmra.mxu1 %vm482_vm1, %v2887_v11 }
 0x134   : > { %2209 = vmatmul.msk.f32.gmra.mxu2 %vm482_vm1, %v2887_v11  ;;  %2215 = vmatmul.msk.f32.gmra.mxu3 %vm482_vm1, %v2938_v25 }
 0x138   : > { %v1456_v46 = vpop.permute.xlu0 %1455 }
 0x139   : > { %v1464_v50 = vsel %vm1463_vm8, %v1456_v46, %v1458_v49 }
 0x13a   : > { %2242 = vmatpush.msk.msra.mxu1 %vm491_vm0, %v1464_v50  ;;  %v1462_v54 = vpop.permute.xlu2 %1461 }
 0x13b   : > { %2205 = vmatmul.msk.f32.gmra.mxu1 %vm482_vm1, %v2902_v16  ;;  %2218 = vmatmul.msk.f32.vlgmr.msra.gmra.mxu0 %vm482_vm1, %v2944_v4 }
 0x13c   : > { %2210 = vmatmul.msk.f32.gmra.mxu2 %vm482_vm1, %v2902_v16  ;;  %2216 = vmatmul.msk.f32.gmra.mxu3 %vm482_vm1, %v2984_v39 }
 0x140   : > { %v3023_v51 = vpop.f32.mrf.mxu0  ;;  %v3025_v52 = vpop.f32.mrf.mxu1 }
 0x141   : > { %v1460_v53 = vpop.permute.xlu0 %1459 }
 0x142   : > { %v1465_v55 = vsel %vm1463_vm8, %v1458_v49, %v1460_v53  ;;  %v1466_v56 = vsel %vm1463_vm8, %v1460_v53, %v1462_v54  ;;  %v1911_v49 = vld [vmem:[#allocation2] sm:$0x1] }
 0x143   : > { %2206 = vmatmul.msk.f32.gmra.mxu1 %vm482_vm1, %v2924_v21  ;;  %2219 = vmatmul.msk.f32.gmra.mxu0 %vm482_vm1, %v2926_v22 }
 0x144   : > { %2211 = vmatmul.msk.f32.gmra.mxu2 %vm482_vm1, %v2924_v21  ;;  %2233 = vmatmul.msk.f32.vlgmr.msra.gmra.mxu3 %vm482_vm1, %v2949_v28 }
 0x145   : > { %2252 = vmatpush.msk.msrb.mxu3 %vm491_vm0, %v1466_v56  ;;  %2247 = vmatpush.msk.msrb.mxu2 %vm491_vm0, %v1465_v55 }
 0x148   : > { %v3039_v58 = vpop.f32.mrf.mxu0  ;;  %v544_v59 = vpop.f32.mrf.mxu1 }
 0x149   : > { %v1606_v60 = vpop.permute.xlu0 %1605 }
 0x14a   : > { %v1612_v61 = vsel %vm1611_vm9, %v1604_v44, %v1606_v60 }
 0x14b   : > { %2220 = vmatmul.msk.f32.gmra.mxu0 %vm482_vm1, %v2938_v25  ;;  %2223 = vmatmul.msk.f32.vlgmr.msrb.gmra.mxu1 %vm482_vm1, %v2944_v4 }
 0x14c   : > { %2228 = vmatmul.msk.f32.vlgmr.msra.gmra.mxu2 %vm482_vm1, %v2949_v28  ;;  %2234 = vmatmul.msk.f32.gmra.mxu3 %vm482_vm1, %v2988_v41 }
 0x14d   : > { %2257 = vmatpush.msk.msra.mxu0 %vm491_vm0, %v1612_v61 }
 0x14f   : > { %v573_v63 = vpop.f32.mrf.mxu2 }
 0x150   : > { %v3053_v0 = vpop.f32.mrf.mxu0  ;;  %v547_v1 = vpop.f32.mrf.mxu1 }
 0x151   : > { %v3055_v3 = vpop.permute.xlu0 %1446 }
 0x153   : > { %2221 = vmatmul.msk.f32.gmra.mxu0 %vm482_vm1, %v2984_v39  ;;  %2224 = vmatmul.msk.f32.gmra.mxu1 %vm482_vm1, %v2926_v22  ;;  %v1443_v22 = vpop.permute.xlu1 %1442 }
 0x154   : > { %2229 = vmatmul.msk.f32.gmra.mxu2 %vm482_vm1, %v2988_v41  ;;  %2235 = vmatmul.msk.f32.gmra.mxu3 %vm482_vm1, %v3008_v45 }
 0x156   : > { %v1610_v12 = vpop.permute.xlu2 %1609 }
 0x157   : > { %v576_v6 = vpop.f32.mrf.mxu2 }
 0x158   : > { %v550_v7 = vpop.f32.mrf.mxu1  ;;  %v651_v8 = vpop.f32.mrf.mxu0 }
 0x159   : > { %v1608_v10 = vpop.permute.xlu0 %1607  ;;  %v652_v13 = vadd.f32 %v651_v8, %v544_v59  ;;  %v1873_v59 = vld [vmem:[%s3299_s7 + $0x8] sm:$0xff] }
 0x15a   : > { %v1613_v11 = vsel %vm1611_vm9, %v1606_v60, %v1608_v10  ;;  %v1614_v20 = vsel %vm1611_vm9, %v1608_v10, %v1610_v12  ;;  %v623_v60 = vadd.f32 %v3010_v47, %v3023_v51  ;;  %1881 = vperm.xlu0 %2369, %v1873_v59   ;;  %v626_v47 = vadd.f32 %v3027_v57, %v3039_v58 }
 0x15b   : > { %2225 = vmatmul.msk.f32.gmra.mxu1 %vm482_vm1, %v2938_v25  ;;  %2238 = vmatmul.msk.f32.vlgmr.msrb.gmra.mxu0 %vm482_vm1, %v2949_v28  ;;  %v1445_v38 = vpop.permute.xlu1 %1444 }
 0x15c   : > { %2230 = vmatmul.msk.f32.gmra.mxu2 %vm482_vm1, %v3008_v45  ;;  %2236 = vmatmul.msk.f32.gmra.mxu3 %vm482_vm1, %v2970_v35 }
 0x15d   : > { %2262 = vmatpush.msk.msrb.mxu1 %vm491_vm0, %v1613_v11  ;;  %2267 = vmatpush.msk.msra.mxu2 %vm491_vm0, %v1614_v20 }
 0x15f   : > { %v579_v14 = vpop.f32.mrf.mxu2  ;;  %v787_v15 = vpop.f32.mrf.mxu3 }
 0x160   : > { %v3077_v16 = vadd.f32 %v787_v15, %v652_v13  ;;  %v553_v2 = vpop.f32.mrf.mxu1  ;;  %v654_v17 = vpop.f32.mrf.mxu0 }
 0x161   : > { %v655_v21 = vadd.f32 %v654_v17, %v547_v1  ;;  %v1595_v51 = vpop.permute.xlu0 %1594 }
 0x163   : > { %2226 = vmatmul.msk.f32.gmra.mxu1 %vm482_vm1, %v2984_v39  ;;  %2239 = vmatmul.msk.f32.gmra.mxu0 %vm482_vm1, %v2988_v41  ;;  %v1779_v39 = vld [vmem:[%s3298_s6 + $0x8] sm:$0xff] }
 0x164   : > { %2231 = vmatmul.msk.f32.gmra.mxu2 %vm482_vm1, %v2970_v35  ;;  %2253 = vmatmul.msk.f32.vlgmr.msrb.gmra.mxu3 %vm482_vm1, %v2986_v40 }
 0x165   : > { %1787 = vperm.xlu1 %2367, %v1779_v39  }
 0x167   : > { %v582_v9 = vpop.f32.mrf.mxu2  ;;  %v790_v23 = vpop.f32.mrf.mxu3 }
 0x168   : > { %v3092_v24 = vadd.f32 %v790_v23, %v655_v21  ;;  %v657_v25 = vpop.f32.mrf.mxu0  ;;  %v680_v4 = vpop.f32.mrf.mxu1 }
 0x169   : > { %v658_v27 = vadd.f32 %v657_v25, %v550_v7  ;;  %v681_v28 = vadd.f32 %v680_v4, %v573_v63 }
 0x16b   : > { %2240 = vmatmul.msk.f32.gmra.mxu0 %vm482_vm1, %v3008_v45  ;;  %2243 = vmatmul.msk.f32.vlgmr.msra.gmra.mxu1 %vm482_vm1, %v2986_v40 }
 0x16c   : > { %2248 = vmatmul.msk.f32.vlgmr.msrb.gmra.mxu2 %vm482_vm1, %v2986_v40  ;;  %2254 = vmatmul.msk.f32.gmra.mxu3 %vm482_vm1, %v1443_v22 }
 0x16d   : > { %1914 = vperm.xlu1 %2367, %v1911_v49  }
 0x16f   : > { %v758_v29 = vpop.f32.mrf.mxu2  ;;  %v793_v30 = vpop.f32.mrf.mxu3 }
 0x170   : > { %v3104_v31 = vadd.f32 %v793_v30, %v658_v27  ;;  %v660_v32 = vpop.f32.mrf.mxu0  ;;  %v683_v33 = vpop.f32.mrf.mxu1  ;;  %v828_v63 = vadd.f32 %v758_v29, %v623_v60 }
 0x171   : > { %v661_v36 = vadd.f32 %v660_v32, %v553_v2  ;;  %v684_v37 = vadd.f32 %v683_v33, %v576_v6 }
 0x173   : > { %2241 = vmatmul.msk.f32.gmra.mxu0 %vm482_vm1, %v2970_v35  ;;  %2244 = vmatmul.msk.f32.gmra.mxu1 %vm482_vm1, %v1443_v22  ;;  %v1591_v35 = vpop.permute.xlu1 %1590 }
 0x174   : > { %2249 = vmatmul.msk.f32.gmra.mxu2 %vm482_vm1, %v1443_v22  ;;  %2255 = vmatmul.msk.f32.gmra.mxu3 %vm482_vm1, %v1445_v38  ;;  %v1778_v22 = vld [vmem:[%s3298_s6] sm:$0xff] }
 0x177   : > { %v761_v40 = vpop.f32.mrf.mxu2  ;;  %v796_v41 = vpop.f32.mrf.mxu3 }
 0x178   : > { %v3117_v42 = vadd.f32 %v796_v41, %v661_v36  ;;  %v686_v43 = vpop.f32.mrf.mxu1  ;;  %v816_v44 = vpop.f32.mrf.mxu0 }
 0x179   : > { %v687_v45 = vadd.f32 %v686_v43, %v579_v14  ;;  %v830_v46 = vadd.f32 %v816_v44, %v681_v28  ;;  %v831_v14 = vadd.f32 %v761_v40, %v626_v47  ;;  %v1872_v28 = vld [vmem:[%s3299_s7] sm:$0xff] }
 0x17b   : > { %2245 = vmatmul.msk.f32.gmra.mxu1 %vm482_vm1, %v1445_v38  ;;  %2258 = vmatmul.msk.f32.vlgmr.msra.gmra.mxu0 %vm482_vm1, %v3012_v48  ;;  %v1593_v61 = vpop.permute.xlu1 %1592 }
 0x17c   : > { %2250 = vmatmul.msk.f32.gmra.mxu2 %vm482_vm1, %v1445_v38  ;;  %2256 = vmatmul.msk.f32.gmra.mxu3 %vm482_vm1, %v3055_v3 }
 0x17f   : > { %v764_v50 = vpop.f32.mrf.mxu2 }
 0x180   : > { %v689_v53 = vpop.f32.mrf.mxu1  ;;  %v819_v54 = vpop.f32.mrf.mxu0 }
 0x181   : > { %v690_v55 = vadd.f32 %v689_v53, %v582_v9  ;;  %v833_v56 = vadd.f32 %v819_v54, %v684_v37 }
 0x183   : > { %2246 = vmatmul.msk.f32.gmra.mxu1 %vm482_vm1, %v3055_v3  ;;  %2259 = vmatmul.msk.f32.gmra.mxu0 %vm482_vm1, %v1591_v35 }
 0x184   : > { %2251 = vmatmul.msk.f32.gmra.mxu2 %vm482_vm1, %v3055_v3  ;;  %v1730_v3 = vld [vmem:[%s3296_s4 + $0x10] sm:$0xff] }
 0x185   : > { %1744 = vperm.xlu2 %2368, %v1730_v3  }
 0x187   : > { %v767_v1 = vpop.f32.mrf.mxu2  ;;  %v964_v6 = vpop.f32.mrf.mxu3 }
 0x188   : > { %v978_v7 = vadd.f32 %v964_v6, %v830_v46  ;;  %v822_v8 = vpop.f32.mrf.mxu0  ;;  %v906_v10 = vpop.f32.mrf.mxu1 }
 0x189   : > { %v836_v11 = vadd.f32 %v822_v8, %v687_v45  ;;  %v976_v13 = vadd.f32 %v906_v10, %v828_v63 }
 0x18b   : > { %2260 = vmatmul.msk.f32.gmra.mxu0 %vm482_vm1, %v1593_v61  ;;  %2263 = vmatmul.msk.f32.vlgmr.msrb.gmra.mxu1 %vm482_vm1, %v3012_v48 }
 0x18c   : > { %2268 = vmatmul.msk.f32.vlgmr.msra.gmra.mxu2 %vm482_vm1, %v3012_v48  ;;  %v629_v48 = vadd.f32 %v3050_v62, %v3053_v0  ;;  %v632_v62 = vadd.f32 %v3065_v5, %v3025_v52 }
 0x18d   : > { %1782 = vperm.xlu2 %2368, %v1778_v22  }
 0x18e   : > { %v834_v57 = vadd.f32 %v764_v50, %v629_v48  ;;  %v837_v0 = vadd.f32 %v767_v1, %v632_v62 }
 0x18f   : > { %v935_v15 = vpop.f32.mrf.mxu2  ;;  %v967_v2 = vpop.f32.mrf.mxu3 }
 0x190   : > { %v977_v17 = vadd.f32 %v935_v15, %v3077_v16  ;;  %v981_v18 = vadd.f32 %v967_v2, %v833_v56  ;;  %v825_v19 = vpop.f32.mrf.mxu0  ;;  %v909_v12 = vpop.f32.mrf.mxu1 }
 0x191   : > { %v839_v20 = vadd.f32 %v825_v19, %v690_v55  ;;  %v979_v21 = vadd.f32 %v909_v12, %v831_v14 }
 0x193   : > { %2261 = vmatmul.msk.f32.gmra.mxu0 %vm482_vm1, %v1595_v51  ;;  %2264 = vmatmul.msk.f32.gmra.mxu1 %vm482_vm1, %v1591_v35 }
 0x194   : > { %2269 = vmatmul.msk.f32.gmra.mxu2 %vm482_vm1, %v1591_v35 }
 0x195   : > { %1876 = vperm.xlu2 %2368, %v1872_v28  }
 0x197   : > { %v938_v58 = vpop.f32.mrf.mxu2  ;;  %v970_v16 = vpop.f32.mrf.mxu3 }
 0x198   : > { %v980_v9 = vadd.f32 %v938_v58, %v3092_v24  ;;  %v984_v23 = vadd.f32 %v970_v16, %v836_v11  ;;  %v912_v25 = vpop.f32.mrf.mxu1  ;;  %v1054_v4 = vpop.f32.mrf.mxu0 }
 0x199   : > { %v982_v26 = vadd.f32 %v912_v25, %v834_v57  ;;  %v1124_v27 = vadd.f32 %v1054_v4, %v976_v13 }
 0x19b   : > { %2265 = vmatmul.msk.f32.gmra.mxu1 %vm482_vm1, %v1593_v61 }
 0x19c   : > { %2270 = vmatmul.msk.f32.gmra.mxu2 %vm482_vm1, %v1593_v61 }
 0x19f   : > { %v941_v29 = vpop.f32.mrf.mxu2  ;;  %v973_v24 = vpop.f32.mrf.mxu3 }
 0x1a0   : > { %v983_v30 = vadd.f32 %v941_v29, %v3104_v31  ;;  %v987_v32 = vadd.f32 %v973_v24, %v839_v20  ;;  %v915_v33 = vpop.f32.mrf.mxu1  ;;  %v1057_v34 = vpop.f32.mrf.mxu0 }
 0x1a1   : > { %v985_v36 = vadd.f32 %v915_v33, %v837_v0  ;;  %v3163_v37 = vadd.f32 %v1057_v34, %v979_v21 }
 0x1a3   : > { %2266 = vmatmul.msk.f32.gmra.mxu1 %vm482_vm1, %v1595_v51 }
 0x1a4   : > { %2271 = vmatmul.msk.f32.gmra.mxu2 %vm482_vm1, %v1595_v51 }
 0x1a7   : > { %v944_v38 = vpop.f32.mrf.mxu2  ;;  %v1202_v39 = vpop.f32.mrf.mxu3 }
 0x1a8   : > { %v986_v40 = vadd.f32 %v944_v38, %v3117_v42  ;;  %v1272_v52 = vadd.f32 %v1202_v39, %v1124_v27  ;;  %v1060_v5 = vpop.f32.mrf.mxu0  ;;  %v1083_v41 = vpop.f32.mrf.mxu1 }
 0x1a9   : > { %v3168_v43 = vadd.f32 %v1060_v5, %v982_v26  ;;  %v1125_v31 = vadd.f32 %v1083_v41, %v977_v17 }
 0x1af   : > { %v1112_v44 = vpop.f32.mrf.mxu2  ;;  %v1205_v42 = vpop.f32.mrf.mxu3 }
 0x1b0   : > { %v1126_v45 = vadd.f32 %v1112_v44, %v978_v7  ;;  %v1063_v46 = vpop.f32.mrf.mxu0  ;;  %v1086_v35 = vpop.f32.mrf.mxu1 }
 0x1b1   : > { %v1133_v49 = vadd.f32 %v1063_v46, %v985_v36  ;;  %v1128_v50 = vadd.f32 %v1086_v35, %v980_v9  ;;  %v3197_v46 = vpop.permute.xlu1 %1749  ;;  %v1275_v35 = vadd.f32 %v1205_v42, %v3163_v37 }
 0x1b7   : > { %v1115_v53 = vpop.f32.mrf.mxu2  ;;  %v1208_v47 = vpop.f32.mrf.mxu3 }
 0x1b8   : > { %v1129_v54 = vadd.f32 %v1115_v53, %v981_v18  ;;  %v1089_v55 = vpop.f32.mrf.mxu1  ;;  %v1231_v56 = vpop.f32.mrf.mxu0 }
 0x1b9   : > { %v1131_v59 = vadd.f32 %v1089_v55, %v983_v30  ;;  %v3170_v60 = vadd.f32 %v1231_v56, %v1125_v31 }
 0x1bf   : > { %v1118_v61 = vpop.f32.mrf.mxu2  ;;  %v1211_v20 = vpop.f32.mrf.mxu3 }
 0x1c0   : > { %v1132_v63 = vadd.f32 %v1118_v61, %v984_v23  ;;  %v1092_v1 = vpop.f32.mrf.mxu1  ;;  %v1234_v6 = vpop.f32.mrf.mxu0 }
 0x1c1   : > { %v1134_v8 = vadd.f32 %v1092_v1, %v986_v40  ;;  %v3172_v10 = vadd.f32 %v1234_v6, %v1128_v50  ;;  %v1281_v50 = vadd.f32 %v1211_v20, %v1133_v49 }
 0x1c7   : > { %v1121_v7 = vpop.f32.mrf.mxu2  ;;  %v3182_v16 = vpop.f32.mrf.mxu3 }
 0x1c8   : > { %v1135_v11 = vadd.f32 %v1121_v7, %v987_v32  ;;  %v1237_v13 = vpop.f32.mrf.mxu0  ;;  %v1260_v3 = vpop.f32.mrf.mxu1 }
 0x1c9   : > { %v3174_v51 = vadd.f32 %v1237_v13, %v1131_v59  ;;  %v1274_v14 = vadd.f32 %v1260_v3, %v1126_v45  ;;  %v1278_v45 = vadd.f32 %v1208_v47, %v3168_v43  ;;  %v3202_v3 = vpop.permute.xlu0 %1739 }
 0x1cf   : > { %v1350_v15 = vpop.f32.mrf.mxu2  ;;  %v1382_v27 = vpop.f32.mrf.mxu3 }
 0x1d0   : > { %v1420_v2 = vadd.f32 %v1350_v15, %v1272_v52  ;;  %v1240_v17 = vpop.f32.mrf.mxu0  ;;  %v1263_v18 = vpop.f32.mrf.mxu1 }
 0x1d1   : > { %v3176_v19 = vadd.f32 %v1240_v17, %v1134_v8  ;;  %v1277_v12 = vadd.f32 %v1263_v18, %v1129_v54 }
 0x1d7   : > { %v1353_v21 = vpop.f32.mrf.mxu2  ;;  %v1385_v32 = vpop.f32.mrf.mxu3 }
 0x1d8   : > { %v1266_v22 = vpop.f32.mrf.mxu1  ;;  %v1408_v48 = vpop.f32.mrf.mxu0  ;;  %v1423_v54 = vadd.f32 %v1353_v21, %v1275_v35  ;;  %v1777_v35 = vld [vmem:[#allocation6 + $0x8] sm:$0xff] }
 0x1d9   : > { %v3178_v57 = vadd.f32 %v1266_v22, %v1132_v63  ;;  %v3180_v58 = vadd.f32 %v1408_v48, %v1274_v14  ;;  %v1735_v14 = vpop.permute.xlu1 %1734  ;;  %v1427_v48 = vadd.f32 %v1385_v32, %v3174_v51 }
 0x1df   : > { %v1356_v9 = vpop.f32.mrf.mxu2  ;;  %v1388_v38 = vpop.f32.mrf.mxu3 }
 0x1e0   : > { %v1269_v23 = vpop.f32.mrf.mxu1  ;;  %v1411_v25 = vpop.f32.mrf.mxu0  ;;  %v1426_v53 = vadd.f32 %v1356_v9, %v1278_v45 }
 0x1e1   : > { %v3184_v4 = vadd.f32 %v1269_v23, %v1135_v11  ;;  %v3186_v26 = vadd.f32 %v1411_v25, %v1277_v12  ;;  %v1745_v47 = vpop.permute.xlu2 %1744  ;;  %v1776_v23 = vld [vmem:[#allocation6] sm:$0xff]  ;;  %v1424_v25 = vadd.f32 %v1382_v27, %v3172_v10 }
 0x1e7   : > { %v1359_v28 = vpop.f32.mrf.mxu2  ;;  %v3194_v5 = vpop.f32.mrf.mxu3 }
 0x1e8   : > { %v3188_v62 = vpop.f32.mrf.mxu0  ;;  %v1498_v0 = vpop.f32.mrf.mxu1  ;;  %v1429_v55 = vadd.f32 %v1359_v28, %v1281_v50  ;;  %v1430_v28 = vadd.f32 %v1388_v38, %v3176_v19 }
 0x1e9   : > { %v1568_v11 = vadd.f32 %v1498_v0, %v1420_v2  ;;  %v1428_v10 = vadd.f32 %v3188_v62, %v3178_v57 }
 0x1ef   : > { %v3190_v29 = vpop.f32.mrf.mxu2  ;;  %v1559_v59 = vpop.f32.mrf.mxu3 }
 0x1f0   : > { %v3192_v24 = vpop.f32.mrf.mxu0  ;;  %v1501_v30 = vpop.f32.mrf.mxu1 }
 0x1f1   : > { %v1571_v61 = vadd.f32 %v1501_v30, %v1423_v54  ;;  %v1421_v30 = vadd.f32 %v3182_v16, %v3170_v60  ;;  %v1431_v60 = vadd.f32 %v3192_v24, %v3184_v4  ;;  %v1570_v54 = vadd.f32 %v3194_v5, %v3180_v58 }
 0x1f3   : > { %v1569_v32 = vadd.f32 %v3190_v29, %v1421_v30  ;;  %v1573_v29 = vadd.f32 %v1559_v59, %v3186_v26 }
 0x1f7   : > { %v1530_v33 = vpop.f32.mrf.mxu2  ;;  %v1562_v22 = vpop.f32.mrf.mxu3 }
 0x1f8   : > { %v1504_v34 = vpop.f32.mrf.mxu1  ;;  %v1646_v36 = vpop.f32.mrf.mxu0  ;;  %v1576_v16 = vadd.f32 %v1562_v22, %v1428_v10 }
 0x1f9   : > { %v1574_v56 = vadd.f32 %v1504_v34, %v1426_v53  ;;  %v1716_v37 = vadd.f32 %v1646_v36, %v1568_v11  ;;  %v1572_v34 = vadd.f32 %v1530_v33, %v1424_v25 }
 0x1fb   : > { %v1752_v18 = vadd.f32 %v1735_v14, %v1716_v37 }
 0x1fd   : > { %v1764_v9 = vmax.f32 %v1752_v18, 0.0 }
 0x1ff   : > { %v1533_v39 = vpop.f32.mrf.mxu2  ;;  %v1565_v19 = vpop.f32.mrf.mxu3 }
 0x200   : > { %v1507_v40 = vpop.f32.mrf.mxu1  ;;  %v1649_v52 = vpop.f32.mrf.mxu0  ;;  %v1575_v0 = vadd.f32 %v1533_v39, %v1427_v48  ;;  %v1579_v50 = vadd.f32 %v1565_v19, %v1431_v60 }
 0x201   : > { %v1577_v63 = vadd.f32 %v1507_v40, %v1429_v55  ;;  %v1719_v13 = vadd.f32 %v1649_v52, %v1571_v61 }
 0x203   : > { %v1755_v15 = vadd.f32 %v3202_v3, %v1719_v13  ;;  %v1788_v13 = vpop.permute.xlu1 %1787 }
 0x205   : > { %v1767_v2 = vmax.f32 %v1755_v15, 0.0 }
 0x207   : > { %v1536_v41 = vpop.f32.mrf.mxu2 }
 0x208   : > { %v1652_v31 = vpop.f32.mrf.mxu0  ;;  %v1675_v44 = vpop.f32.mrf.mxu1  ;;  %v1578_v36 = vadd.f32 %v1536_v41, %v1430_v28 }
 0x209   : > { %v1722_v1 = vadd.f32 %v1652_v31, %v1574_v56  ;;  %v1717_v27 = vadd.f32 %v1675_v44, %v1569_v32 }
 0x20b   : > { %v1758_v49 = vadd.f32 %v1745_v47, %v1722_v1  ;;  %v1753_v57 = vadd.f32 %v1735_v14, %v1717_v27 }
 0x20d   : > { %v1770_v20 = vmax.f32 %v1758_v49, 0.0  ;;  %v1765_v59 = vmax.f32 %v1753_v57, 0.0 }
 0x20f   : > { %v3200_v6 = vpop.f32.mrf.mxu2 }
 0x210   : > { %v1655_v8 = vpop.f32.mrf.mxu0  ;;  %v1678_v7 = vpop.f32.mrf.mxu1  ;;  %v1718_v24 = vadd.f32 %v3200_v6, %v1570_v54  ;;  %v1947_v54 = vld [vmem:[%s442_s12] sm:$0x7] }
 0x211   : > { %v1725_v43 = vadd.f32 %v1655_v8, %v1577_v63  ;;  %v1720_v31 = vadd.f32 %v1678_v7, %v1572_v34  ;;  %v1783_v6 = vpop.permute.xlu2 %1782 }
 0x212   : > { %v1754_v8 = vadd.f32 %v1735_v14, %v1718_v24 }
 0x213   : > { %v1761_v42 = vadd.f32 %v3197_v46, %v1725_v43  ;;  %v1756_v33 = vadd.f32 %v3202_v3, %v1720_v31 }
 0x214   : > { %v1766_v5 = vmax.f32 %v1754_v8, 0.0 }
 0x215   : > { %v1773_v17 = vmax.f32 %v1761_v42, 0.0  ;;  %v1768_v4 = vmax.f32 %v1756_v33, 0.0  ;;  %v1882_v42 = vpop.permute.xlu0 %1881 }
 0x217   : > { %v1707_v12 = vpop.f32.mrf.mxu2  ;;  %1809 = vmatpush.msra.mxu3 %v1773_v17 }
 0x218   : > { %v1681_v21 = vpop.f32.mrf.mxu1  ;;  %v1721_v55 = vadd.f32 %v1707_v12, %v1573_v29 }
 0x219   : > { %1810 = vmatpush.msra.mxu3 %v1770_v20  ;;  %v1723_v40 = vadd.f32 %v1681_v21, %v1575_v0  ;;  %v1877_v49 = vpop.permute.xlu2 %1876 }
 0x21a   : > { %v1757_v63 = vadd.f32 %v3202_v3, %v1721_v55 }
 0x21b   : > { %1811 = vmatpush.msra.mxu3 %v1767_v2  ;;  %v1759_v38 = vadd.f32 %v1745_v47, %v1723_v40 }
 0x21c   : > { %v1769_v58 = vmax.f32 %v1757_v63, 0.0  ;;  %v1931_v63 = vlaneseq }
 0x21d   : > { %1812 = vmatpush.msra.mxu3 %v1764_v9  ;;  %v1771_v62 = vmax.f32 %v1759_v38, 0.0  ;;  %v1915_v38 = vpop.permute.xlu1 %1914 }
 0x21e   : > { %2272 = vmatmul.msk.f32.vlgmr.msra.gmra.mxu3 %vm1790_vm10, %v1776_v23  ;;  %vm1933_vm13 = vcmp.lt.s32.totalorder %v1931_v63, 384 }
 0x21f   : > { %v1710_v52 = vpop.f32.mrf.mxu2 }
 0x220   : > { %v1684_v51 = vpop.f32.mrf.mxu1  ;;  %v1724_v53 = vadd.f32 %v1710_v52, %v1576_v16  ;;  %v1936_v16 = vld [vmem:[%s2708_s17] sm:$0x7] }
 0x221   : > { %v1726_v45 = vadd.f32 %v1684_v51, %v1578_v36  ;;  %v1938_v57 = vperm.slane %v1936_v16, 0 }
 0x222   : > { %v1760_v61 = vadd.f32 %v1745_v47, %v1724_v53 }
 0x223   : > { %v1762_v39 = vadd.f32 %v3197_v46, %v1726_v45 }
 0x224   : > { %v1772_v7 = vmax.f32 %v1760_v61, 0.0  ;;  %v1939_v61 = vperm.slane %v1936_v16, 1 }
 0x225   : > { %v1774_v41 = vmax.f32 %v1762_v39, 0.0 }
 0x226   : > { %2273 = vmatmul.msk.f32.gmra.mxu3 %vm1790_vm10, %v1777_v35 }
 0x227   : > { %v1713_v44 = vpop.f32.mrf.mxu2  ;;  %1832 = vmatpush.msrb.mxu3 %v1774_v41  ;;  %v1917_v41 = vperm.slane %v1915_v38, 0 }
 0x228   : > { %v1727_v56 = vadd.f32 %v1713_v44, %v1579_v50 }
 0x229   : > { %1833 = vmatpush.msrb.mxu3 %v1771_v62 }
 0x22a   : > { %v1763_v26 = vadd.f32 %v3197_v46, %v1727_v56 }
 0x22b   : > { %1834 = vmatpush.msrb.mxu3 %v1768_v4 }
 0x22c   : > { %v1775_v1 = vmax.f32 %v1763_v26, 0.0  ;;  %v1949_v26 = vperm.slane %v1947_v54, 0 }
 0x22d   : > { %1835 = vmatpush.msrb.mxu3 %v1765_v59 }
 0x22e   : > { %1855 = vmatpush.msrb.mxu0 %v1775_v1  ;;  %2274 = vmatmul.msk.f32.vlgmr.msrb.gmra.mxu3 %vm1790_vm10, %v1776_v23  ;;  %v1940_v1 = vperm.slane %v1936_v16, 2 }
 0x230   : > { %1856 = vmatpush.msrb.mxu0 %v1772_v7  ;;  %v1950_v7 = vperm.slane %v1947_v54, 1 }
 0x232   : > { %1857 = vmatpush.msrb.mxu0 %v1769_v58 }
 0x234   : > { %1858 = vmatpush.msrb.mxu0 %v1766_v5  ;;  %v1951_v5 = vperm.slane %v1947_v54, 2 }
 0x235   : > { %2276 = vmatmul.msk.f32.vlgmr.msrb.gmra.mxu0 %vm1790_vm10, %v1776_v23 }
 0x236   : > { %2275 = vmatmul.msk.f32.gmra.mxu3 %vm1790_vm10, %v1777_v35 }
 0x23d   : > { %2277 = vmatmul.msk.f32.gmra.mxu0 %vm1790_vm10, %v1777_v35 }
 0x2a1   : > { %v1814_v46 = vpop.f32.mrf.mxu3 }
 0x2a2   : > { %v1815_v11 = vadd.f32 %v1814_v46, %v1783_v6 }
 0x2a4   : > { %v1866_v3 = vmax.f32 %v1815_v11, 0.0 }
 0x2a6   : > { %v1884_v14 = vmul.f32 %v1877_v49, %v1866_v3 }
 0x2a9   : > { %v1817_v43 = vpop.f32.mrf.mxu3 }
 0x2aa   : > { %v1818_v47 = vadd.f32 %v1817_v43, %v1788_v13 }
 0x2ac   : > { %v1869_v37 = vmax.f32 %v1818_v47, 0.0 }
 0x2ae   : > { %v1887_v15 = vmul.f32 %v1882_v42, %v1869_v37 }
 0x2b0   : > { %v1890_v17 = vadd.f32 %v1887_v15, %v1884_v14 }
 0x2b1   : > { %v1837_v18 = vpop.f32.mrf.mxu3 }
 0x2b2   : > { %v1891_v12 = vrot.slane %v1890_v17, 4  ;;  %v1860_v20 = vpop.f32.mrf.mxu0  ;;  %v1838_v22 = vadd.f32 %v1837_v18, %v1783_v6 }
 0x2b3   : > { %v1861_v2 = vadd.f32 %v1860_v20, %v1783_v6 }
 0x2b4   : > { %v1892_v21 = vadd.f32 %v1891_v12, %v1890_v17  ;;  %v1867_v23 = vmax.f32 %v1838_v22, 0.0 }
 0x2b5   : > { %v1868_v0 = vmax.f32 %v1861_v2, 0.0 }
 0x2b6   : > { %v1893_v48 = vrot.slane %v1892_v21, 2  ;;  %v1885_v52 = vmul.f32 %v1877_v49, %v1867_v23 }
 0x2b7   : > { %v1886_v32 = vmul.f32 %v1877_v49, %v1868_v0 }
 0x2b8   : > { %v1894_v34 = vadd.f32 %v1893_v48, %v1892_v21 }
 0x2b9   : > { %v1840_v9 = vpop.f32.mrf.mxu3 }
 0x2ba   : > { %v1841_v25 = vadd.f32 %v1840_v9, %v1788_v13  ;;  %v1863_v28 = vpop.f32.mrf.mxu0  ;;  %v1895_v45 = vrot.slane %v1894_v34, 1 }
 0x2bb   : > { %v1864_v30 = vadd.f32 %v1863_v28, %v1788_v13 }
 0x2bc   : > { %v1870_v36 = vmax.f32 %v1841_v25, 0.0  ;;  %v1896_v35 = vadd.f32 %v1895_v45, %v1894_v34 }
 0x2bd   : > { %v1871_v40 = vmax.f32 %v1864_v30, 0.0 }
 0x2be   : > { %v1888_v51 = vmul.f32 %v1882_v42, %v1870_v36  ;;  %v1918_v53 = vadd.f32 %v1917_v41, %v1896_v35 }
 0x2bf   : > { %v1889_v31 = vmul.f32 %v1882_v42, %v1871_v40 }
 0x2c0   : > { %v1897_v10 = vadd.f32 %v1888_v51, %v1885_v52  ;;  %v1944_v4 = vsub.f32 %v1918_v53, %v1938_v57 }
 0x2c1   : > { %v1904_v19 = vadd.f32 %v1889_v31, %v1886_v32 }
 0x2c2   : > { %v1898_v27 = vrot.slane %v1897_v10, 4  ;;  %v1955_v11 = vmul.f32 %v1949_v26, %v1944_v4 }
 0x2c3   : > { %v1905_v39 = vrot.slane %v1904_v19, 4 }
 0x2c4   : > { %v1899_v60 = vadd.f32 %v1898_v27, %v1897_v10  ;;  %v1958_v42 = vmul.f32 %v1955_v11, %v1955_v11 }
 0x2c5   : > { %v1906_v33 = vadd.f32 %v1905_v39, %v1904_v19 }
 0x2c6   : > { %v1900_v29 = vrot.slane %v1899_v60, 2 }
 0x2c7   : > { %v1907_v50 = vrot.slane %v1906_v33, 2 }
 0x2c8   : > { %v1901_v62 = vadd.f32 %v1900_v29, %v1899_v60 }
 0x2c9   : > { %v1908_v44 = vadd.f32 %v1907_v50, %v1906_v33 }
 0x2ca   : > { %v1902_v55 = vrot.slane %v1901_v62, 1 }
 0x2cb   : > { %v1909_v56 = vrot.slane %v1908_v44, 1 }
 0x2cc   : > { %v1903_v24 = vadd.f32 %v1902_v55, %v1901_v62 }
 0x2cd   : > { %v1910_v59 = vadd.f32 %v1909_v56, %v1908_v44 }
 0x2ce   : > { %v1919_v8 = vadd.f32 %v1917_v41, %v1903_v24 }
 0x2cf   : > { %v1920_v58 = vadd.f32 %v1917_v41, %v1910_v59 }
 0x2d0   : > { %v1924_v46 = vrot.slane %v1919_v8, 7  ;;  %v1945_v6 = vsub.f32 %v1919_v8, %v1939_v61 }
 0x2d1   : > { %v1925_v13 = vrot.slane %v1920_v58, 6  ;;  %v1946_v43 = vsub.f32 %v1920_v58, %v1940_v1 }
 0x2d2   : > { %v1927_v3 = vsel %vm1926_vm11, %v1918_v53, %v1924_v46  ;;  %v1956_v47 = vmul.f32 %v1950_v7, %v1945_v6 }
 0x2d3   : > { %v1929_v37 = vsel %vm1928_vm12, %v1927_v3, %v1925_v13  ;;  %v1957_v49 = vmul.f32 %v1951_v5, %v1946_v43 }
 0x2d4   : > { %1935 = vst.msk [vmem:[%s427_s26] sm:$0x7] %vm1933_vm13, %v1929_v37  ;;  %v1959_v14 = vmul.f32 %v1956_v47, %v1956_v47 }
 0x2d5   : > { %2457 = shalt.err (!%p2454_p10)
}
 0x2d6   : > { %2293 = dma.vmem_to_hbm [thread:$0]  (%p2671_p0), %s1982_s29, 48, %s1984_s30, %s1965_s11   ;;  %v1960_v15 = vmul.f32 %v1957_v49, %v1957_v49  ;;  %v1961_v17 = vadd.f32 %v1959_v14, %v1958_v42 }
 0x2d7   : > { %s1970_s25 = scalar_lea.sflag [#allocation10], %s2702_s14  ;;  %s2472_s26 = sshra.s32 %s1997_s22, 4  ;;  %s2473_s26 = int_to_ptr.hbm [resolvable:$true] %s2472_s26 }
 0x2d8   : > { %v1962_v18 = vadd.f32 %v1961_v17, %v1960_v15  ;;  %s2474_s27 = scalar_lea.hbm %s2473_s26, 1  ;;  %s2478_s8 = scalar_lea.hbm %s3302_s10, 2 }
 0x2d9   : > { %p2475_p11 = scmp.ne.s32.totalorder %s2473_s26, %s2474_s27  ;;  %p2479_p4 = scmp.lt.s32.totalorder %s2473_s26, %s3302_s10 }
 0x2da   : > { %1963 = vst [vmem:[%s433_s18] sm:$0x1] %v1962_v18  ;;  %p2480_p3 = scmp.lt.s32.totalorder %s2478_s8, %s2474_s27 }
 0x2db   : > { %p2476_p12 = pnand %p2475_p11, %p2671_p0 }
 0x2dc   : > { %p2481_p1 = por %p2480_p3, %p2479_p4 }
 0x2dd   : > { %p2477_p2 = pneg %p2476_p12 }
 0x2df   : > { %p2482_p5 = pnand %p2481_p1, %p2477_p2 }
 0x2e1   : > { %2485 = shalt.err (!%p2482_p5)
}
 0x2e2   : > { %2294 = dma.vmem_to_hbm [thread:$0]  (%p2671_p0), %s1995_s28, 16, %s1997_s22, %s1970_s25  }
 0x2e3 PF: > { %s3321_s30 = sld [smem:[#allocation16_spill]]  ;;  %s2008_s18 = sand.u32 1, %s2520_s15  }
 0x2e4   : > { %s2009_s11 = scalar_lea.sflag [#allocation5], %s2008_s18 }
 0x2e9   : > { %p3322_p13 = scmp.ge.s32.totalorder %s3321_s30, 2 }
 0x2eb   : > { %p2306_p8 = pnand %p3322_p13, %p2677_p6 }
 0x2ed   : > { %p2307_p7 = pneg %p2306_p8 }
 0x2ef   : > { %2511 = dma.done.wait (%p2307_p7), %s2009_s11, 48  }
 0x2f0   : > { %2513 = vsyncadd (%p2307_p7), %s2009_s11, 4294967248  ;;  %s2019_s21 = scalar_lea.sflag [#allocation10], %s2008_s18 }
 0x2f1   : > { %2515 = dma.done.wait (%p2307_p7), %s2019_s21, 16  }
 0x2f2   : > { %2517 = vsyncadd (%p2307_p7), %s2019_s21, 4294967280  ;;  %s3323_s18 = sld [smem:[#allocation17_spill]]  ;;  %s3326_s15 = smov %s2524_s16 }
 0x2f3   : > { %s3324_s12 = sld [smem:[#allocation15_spill]] }
 0x2f4   : > { %s3325_s17 = sld [smem:[#allocation18_spill]] }
 0x2f8   : > { %p30_p0 = scmp.ge.s32.totalorder %s3323_s18, 4  }
 0x2f9   : > { %s3327_s16 = smov %s3324_s12 }
 0x2fa   :  { %32 = sbr.rel (!%p30_p0) target bundleno = 11 (0xb), region = 137 }
 0x2ff   :  { %2024 = vsyncpa [#allocation4], 1 }
 0x300   :  { %2026 = vsyncpa [#allocation4 + $0x1], 1 }
 0x301   :  { %2027 = vsyncpa [#allocation7], 1 }
 0x302   :  { %2028 = vsyncpa [#allocation5], 1 }
 0x303   :  { %2030 = vsyncpa [#allocation5 + $0x1], 1 }
 0x304   :  { %2031 = vsyncpa [#allocation10], 1 }
 0x305   :  { %2033 = vsyncpa [#allocation10 + $0x1], 1 }

</bundles_post_ra>
